<compile_context>
chip_gen: v7x
topology: tpu7x:2x2x1
jax: 0.10.0
libtpu: 0.0.40
codegen_flags: <defaults>
</compile_context>

<pallas_src>
import functools

import jax
import jax.numpy as jnp
import numpy as np
from jax import lax
from jax.experimental import pallas as pl
from jax.experimental.pallas import tpu as pltpu


# ------------------------------ fused kernel --------------------------------


def _make_kernel(C, H, W, r, c_hidden):
    """Builds the per-grid-step kernel body (static shapes captured here)."""
    r2 = r * r
    ic = C * r2
    HW = H * W
    n = HW // r2
    G = n // ic
    C1 = c_hidden
    f32, bf16 = jnp.float32, jnp.bfloat16
    taps = [(ki - 1, kj - 1) for ki in range(3) for kj in range(3)]  # (di, dj)

    def kernel(x_ref, wgtp_ref, bgtp_ref, ws4_ref, wca_ref, biasl_ref,
               sel_ref, msk_ref, w1s_ref, b1_ref, w2s_ref, b2_ref,
               z_ref, logit_ref, zstk_ref, hstk_ref):
        # hoist the (small) constant loads out of the per-image loop
        wgtp = wgtp_ref[...]          # (3ic, ic) bf16
        bgtp = bgtp_ref[...]          # (3ic, 1)  f32
        ws4 = ws4_ref[...]            # (ic, ic)  bf16  (gamma_s * kron(W_s, I))
        wca = wca_ref[...]            # (G*ic, n) bf16  (gamma_c * W_c folded)
        biasl = biasl_ref[...]        # (ic, 1)   f32
        sel = sel_ref[...]            # (r2, C, ic) f32 0/1 row selectors
        msk = msk_ref[...]            # (9, HW)   f32 border masks
        w1s = w1s_ref[...]            # (C1, 9C)  bf16
        b1 = b1_ref[...]              # (C1, 1)   f32
        w2s = w2s_ref[...]            # (1, 9*C1) bf16
        b2 = b2_ref[...]              # (1, 1)    f32

        bk = x_ref.shape[0]
        for i in range(bk):
            xi = x_ref[i]                                           # (ic, n) f32

            # fused g / theta / phi 1x1 convs: one (3ic, ic)@(ic, n) matmul
            gtp = jnp.dot(wgtp, xi.astype(bf16),
                          preferred_element_type=f32) + bgtp        # (3ic, n)
            g, th, ph = gtp[:ic], gtp[ic:2 * ic], gtp[2 * ic:]
            gb, thb, phb = g.astype(bf16), th.astype(bf16), ph.astype(bf16)

            # spatial attention: f_s = theta^T @ phi -> (n, n), softmax rows
            f_s = lax.dot_general(thb, phb, (((0,), (0,)), ((), ())),
                                  preferred_element_type=f32)
            f_s = f_s - jnp.max(f_s, axis=-1, keepdims=True)
            e_s = jnp.exp(f_s)
            p_s = e_s * pl.reciprocal(jnp.sum(e_s, axis=-1, keepdims=True),
                                      approx=True)

            # channel attention: f_c = theta @ phi^T -> (ic, ic), softmax rows
            f_c = lax.dot_general(thb, phb, (((1,), (1,)), ((), ())),
                                  preferred_element_type=f32)
            f_c = f_c - jnp.max(f_c, axis=-1, keepdims=True)
            e_c = jnp.exp(f_c)
            p_c = e_c * pl.reciprocal(jnp.sum(e_c, axis=-1, keepdims=True),
                                      approx=True)

            # y_s in (ic, n) == Lambda1 layout; y_c in (n, ic)
            ys = lax.dot_general(gb, p_s.astype(bf16), (((1,), (1,)), ((), ())),
                                 preferred_element_type=f32)        # (ic, n)
            yc = lax.dot_general(gb, p_c.astype(bf16), (((0,), (0,)), ((), ())),
                                 preferred_element_type=f32)        # (n, ic)

            # z (Lambda1) = x + gamma_s*(W_s y_s + b_s) + gamma_c*(W_c y_c + b_c)
            wsys = jnp.dot(ws4, ys.astype(bf16),
                           preferred_element_type=f32)              # (ic, n)
            t_all = jnp.dot(wca, yc.astype(bf16),
                            preferred_element_type=f32)             # (G*ic, ic)
            # rp placement == static column blocks [u*ic:(u+1)*ic]
            tcols = jnp.concatenate(
                [t_all[u * ic:(u + 1) * ic, :] for u in range(G)], axis=-1)
            zl = xi + biasl + wsys + tcols                          # (ic, n)

            # Lambda1 (ic, n) -> lane-dense image layout (C, HW):
            # row selection (exact f32) + side-by-side lane placement
            z_img = jnp.concatenate(
                [jnp.dot(sel[j], zl, preferred_element_type=f32)
                 for j in range(r2)], axis=-1)                      # (C, HW)
            z_ref[i] = z_img

            # getmask conv1 (3x3, C->C1): roll + border mask -> stack -> 1 matmul
            for k, (di, dj) in enumerate(taps):
                d = di * W + dj
                plane = z_img if d == 0 else pltpu.roll(
                    z_img, shift=(-d) % HW, axis=1)
                zstk_ref[k * C:(k + 1) * C, :] = plane * msk[k:k + 1, :]
            h1 = jnp.dot(w1s, zstk_ref[...].astype(bf16),
                         preferred_element_type=f32) + b1           # (C1, HW)
            h1 = jnp.maximum(h1, 0.0)

            # getmask conv2 (3x3, C1->1): same structure
            for k, (di, dj) in enumerate(taps):
                d = di * W + dj
                plane = h1 if d == 0 else pltpu.roll(
                    h1, shift=(-d) % HW, axis=1)
                hstk_ref[k * C1:(k + 1) * C1, :] = plane * msk[k:k + 1, :]
            logit_ref[i] = jnp.dot(w2s, hstk_ref[...].astype(bf16),
                                   preferred_element_type=f32) + b2  # (1, HW)

    return kernel


# ------------------------- host-side constant folding ------------------------


def _build_constants(p, C, H, W, r):
    """Fold gamma, W_s, W_c, biases, layout permutations, border masks and the
    3x3-conv taps into SMALL constant matrices (total ~25 KB)."""
    r2 = r * r
    ic = C * r2
    HW = H * W
    n = HW // r2
    assert n % ic == 0, "kernel assumes (H*W)/r^2 divisible by C*r^2"
    G = n // ic
    f32 = np.float32

    wg = np.asarray(p['wg'], f32); bg = np.asarray(p['bg'], f32).reshape(ic, 1)
    wt = np.asarray(p['wt'], f32); bt = np.asarray(p['bt'], f32).reshape(ic, 1)
    wp = np.asarray(p['wp'], f32); bp = np.asarray(p['bp'], f32).reshape(ic, 1)
    ws = np.asarray(p['ws'], f32); bs = np.asarray(p['bs'], f32).reshape(C)
    wc = np.asarray(p['wc'], f32); bc = np.asarray(p['bc'], f32).reshape(C)
    gamma_s = float(np.asarray(p['gamma'])[0])
    gamma_c = float(np.asarray(p['gamma'])[1])
    w1 = np.asarray(p['w1'], f32); b1 = np.asarray(p['b1'], f32).reshape(-1, 1)
    w2 = np.asarray(p['w2'], f32); b2 = np.asarray(p['b2'], f32).reshape(-1, 1)
    C1 = w1.shape[0]

    # fused g/theta/phi projection
    wgtp = np.concatenate([wg, wt, wp], axis=0)                      # (3ic, ic)
    bgtp = np.concatenate([bg, bt, bp], axis=0)                      # (3ic, 1)

    # gamma_s * W_s as a row-mixing matrix in the (ic, n) Lambda1 layout
    ws4 = (gamma_s * np.kron(ws, np.eye(r2, dtype=f32))).astype(f32)  # (ic, ic)

    # gamma_c * W_c on the y_c path, stacked over the G column blocks:
    # zl[:, u*ic:(u+1)*ic] += (wca_stk @ y_c)[u*ic:(u+1)*ic, :]
    wca = np.zeros((G, ic, n), f32)
    for u in range(G):
        for R in range(ic):
            c_out, jj = R // r2, R % r2
            for c2 in range(C):
                wca[u, R, (c2 * r2 + jj) * G + u] = gamma_c * wc[c_out, c2]
    wca_stk = wca.reshape(G * ic, n)                                 # (G*ic, n)

    # per-row bias in Lambda1 layout (channel of row R is R // r2)
    biasl = (gamma_s * bs + gamma_c * bc)[np.arange(ic) // r2]
    biasl = biasl.astype(f32).reshape(ic, 1)

    # Lambda1 -> image: tiny 0/1 row selectors (replaces the old pp constant)
    sel = np.zeros((r2, C, ic), f32)
    for j in range(r2):
        for c in range(C):
            sel[j, c, c * r2 + j] = 1.0

    # 3x3 border masks on the flattened HW axis (zero-padding + roll wrap fix)
    msk = np.zeros((9, HW), f32)
    for k in range(9):
        di, dj = k // 3 - 1, k % 3 - 1
        m2 = np.zeros((H, W), f32)
        m2[max(0, -di):H - max(0, di), max(0, -dj):W - max(0, dj)] = 1.0
        msk[k] = m2.reshape(-1)

    # stacked conv weights: W1stk[o, k*C + c] = w1[o, c, ki, kj], k = ki*3 + kj
    w1s = np.transpose(w1, (0, 2, 3, 1)).reshape(C1, 9 * C)
    w2s = np.transpose(w2, (0, 2, 3, 1)).reshape(w2.shape[0], 9 * C1)

    out = dict(wgtp=wgtp, bgtp=bgtp, ws4=ws4, wca=wca_stk, biasl=biasl,
               sel=sel, msk=msk, w1s=w1s, b1=b1, w2s=w2s, b2=b2)
    bf16_keys = {'wgtp', 'ws4', 'wca', 'w1s', 'w2s'}   # MXU-weight operands
    return {k: jnp.asarray(v, jnp.bfloat16 if k in bf16_keys else jnp.float32)
            for k, v in out.items()}


# --------------------------------- wrapper -----------------------------------


def _const_spec(shape):
    # whole array, same block every grid step (fetched once by the pipeline)
    nd = len(shape)
    return pl.BlockSpec(shape, lambda b, _nd=nd: (0,) * _nd)


def _pick_block_batch(B):
    # A few images per grid step amortizes the ~0.35us/step pipeline overhead,
    # but keep >= 2 grid steps so both v7x TensorCores get work.
    if B <= 2:
        return 1
    for bk in (4, 3, 2):
        if B % bk == 0 and B // bk >= 2:
            return bk
    return 1


def nonlocal_mask_forward(x, p, r, bk=None):
    """Pallas implementation of NonLocalMask.forward.  Returns (logit, z)."""
    B, C, H, W = x.shape
    r2 = r * r
    ic = C * r2
    HW = H * W
    n = HW // r2
    C1 = int(p['w1'].shape[0])
    if bk is None:
        bk = _pick_block_batch(B)

    consts = _build_constants(p, C, H, W, r)
    const_order = ['wgtp', 'bgtp', 'ws4', 'wca', 'biasl',
                   'sel', 'msk', 'w1s', 'b1', 'w2s', 'b2']
    const_arrays = [consts[k] for k in const_order]

    x_l1 = x.reshape(B, ic, n)        # free host reshape: x1 / Lambda1 layout

    kernel = _make_kernel(C, H, W, r, C1)

    in_specs = [pl.BlockSpec((bk, ic, n), lambda b: (b, 0, 0))]
    in_specs += [_const_spec(a.shape) for a in const_arrays]

    z_flat, logit_flat = pl.pallas_call(
        kernel,
        grid=(B // bk,),
        in_specs=in_specs,
        out_specs=[pl.BlockSpec((bk, C, HW), lambda b: (b, 0, 0)),
                   pl.BlockSpec((bk, 1, HW), lambda b: (b, 0, 0))],
        out_shape=[jax.ShapeDtypeStruct((B, C, HW), jnp.float32),
                   jax.ShapeDtypeStruct((B, 1, HW), jnp.float32)],
        scratch_shapes=[pltpu.VMEM((9 * C, HW), jnp.float32),    # conv1 stack
                        pltpu.VMEM((9 * C1, HW), jnp.float32)],  # conv2 stack
        compiler_params=pltpu.CompilerParams(
            dimension_semantics=("parallel",)),
    )(x_l1, *const_arrays)

    logit = logit_flat.reshape(B, 1, H, W)
    z = z_flat.reshape(B, C, H, W)
    return logit, z


# ----------------------------- pure-JAX reference -----------------------------


def reference_forward(x, p, r):
    B, C, H, W = x.shape
    ic = C * r * r
    n = (H // r) * (W // r)
    x1 = x.reshape(B, ic, n)

    def conv1x1(w, b, inp):
        return jnp.einsum('oc,bcn->bon', w, inp) + b.reshape(1, -1, 1)

    g_x = conv1x1(p['wg'], p['bg'], x1)
    th = conv1x1(p['wt'], p['bt'], x1)
    ph = conv1x1(p['wp'], p['bp'], x1)
    g_xT = jnp.swapaxes(g_x, 1, 2)                                    # (B,n,ic)

    f_s = jax.nn.softmax(jnp.einsum('bmi,bmj->bij', th, ph), axis=-1)  # (B,n,n)
    f_c = jax.nn.softmax(jnp.einsum('bpi,bqi->bpq', th, ph), axis=-1)  # (B,ic,ic)

    y_s = jnp.einsum('bij,bja->bia', f_s, g_xT)                        # (B,n,ic)
    y_s_img = jnp.swapaxes(y_s, 1, 2).reshape(B, C, H, W)
    y_c = jnp.einsum('bia,baq->biq', g_xT, f_c)                        # (B,n,ic)
    y_c_img = y_c.reshape(B, C, H, W)

    Wsy = jnp.einsum('oc,bchw->bohw', p['ws'], y_s_img) + p['bs'].reshape(1, -1, 1, 1)
    Wcy = jnp.einsum('oc,bchw->bohw', p['wc'], y_c_img) + p['bc'].reshape(1, -1, 1, 1)
    z = x + p['gamma'][0] * Wsy + p['gamma'][1] * Wcy

    dn = ('NCHW', 'OIHW', 'NCHW')
    h1 = lax.conv_general_dilated(z, p['w1'], (1, 1), ((1, 1), (1, 1)),
                                  dimension_numbers=dn) + p['b1'].reshape(1, -1, 1, 1)
    h1 = jnp.maximum(h1, 0.0)
    logit = lax.conv_general_dilated(h1, p['w2'], (1, 1), ((1, 1), (1, 1)),
                                     dimension_numbers=dn) + p['b2'].reshape(1, -1, 1, 1)
    return logit, z


# ----------------------------------- main --------------------------------------


if __name__ == "__main__":
    B, C, H, W = 2, 4, 16, 16
    r = 2
    ic = C * r * r            # 16
    hidden = 16

    key = jax.random.PRNGKey(0)
    ks = jax.random.split(key, 16)

    def w_init(k, shape, scale=0.1):
        return (scale * jax.random.normal(k, shape)).astype(jnp.float32)

    params = {
        'wg': w_init(ks[0], (ic, ic)), 'bg': w_init(ks[1], (ic, 1)),
        'wt': w_init(ks[2], (ic, ic)), 'bt': w_init(ks[3], (ic, 1)),
        'wp': w_init(ks[4], (ic, ic)), 'bp': w_init(ks[5], (ic, 1)),
        'ws': w_init(ks[6], (C, C)),   'bs': w_init(ks[7], (C, 1)),
        'wc': w_init(ks[8], (C, C)),   'bc': w_init(ks[9], (C, 1)),
        'gamma': jnp.ones((2,), jnp.float32),        # gamma_s, gamma_c (init=1)
        'w1': w_init(ks[10], (hidden, C, 3, 3)), 'b1': w_init(ks[11], (hidden, 1)),
        'w2': w_init(ks[12], (1, hidden, 3, 3)), 'b2': w_init(ks[13], (1, 1)),
    }

    x = jax.random.normal(ks[14], (B, C, H, W), dtype=jnp.float32)

    logit, z = nonlocal_mask_forward(x, params, r)
    logit, z = jax.block_until_ready((logit, z))

    # sanity check against a pure-JAX reference
    # (loose tol: bf16 MXU operands + approx reciprocal in the softmax)
    ref_logit, ref_z = reference_forward(x, params, r)
    err_z = float(jnp.max(jnp.abs(z - ref_z)))
    err_l = float(jnp.max(jnp.abs(logit - ref_logit)))
    assert logit.shape == (B, 1, H, W) and z.shape == (B, C, H, W)
    assert err_z < 5e-2 and err_l < 5e-2, (err_z, err_l)

    print("KERNEL_OK")
</pallas_src>

<mosaic_0001>
module attributes {stable_mosaic.version = 11 : i64} {
  func.func @kernel(%arg0: i32, %arg1: memref<1x16x64xf32, #tpu.memory_space<vmem>>, %arg2: memref<48x16xbf16, #tpu.memory_space<vmem>>, %arg3: memref<48x1xf32, #tpu.memory_space<vmem>>, %arg4: memref<16x16xbf16, #tpu.memory_space<vmem>>, %arg5: memref<64x64xbf16, #tpu.memory_space<vmem>>, %arg6: memref<16x1xf32, #tpu.memory_space<vmem>>, %arg7: memref<4x4x16xf32, #tpu.memory_space<vmem>>, %arg8: memref<9x256xf32, #tpu.memory_space<vmem>>, %arg9: memref<16x36xbf16, #tpu.memory_space<vmem>>, %arg10: memref<16x1xf32, #tpu.memory_space<vmem>>, %arg11: memref<1x144xbf16, #tpu.memory_space<vmem>>, %arg12: memref<1x1xf32, #tpu.memory_space<vmem>>, %arg13: memref<1x4x256xf32, #tpu.memory_space<vmem>>, %arg14: memref<1x1x256xf32, #tpu.memory_space<vmem>>, %arg15: memref<36x256xf32, #tpu.memory_space<vmem>>, %arg16: memref<144x256xf32, #tpu.memory_space<vmem>>) attributes {dimension_semantics = [#tpu.dimension_semantics<parallel>], iteration_bounds = array<i64: 2>, scalar_prefetch = 0 : i64, scratch_operands = 2 : i64, tpu.core_type = #tpu.core_type<tc>, window_params = [{transform_indices = @transform_0, window_bounds = array<i64: 1, 16, 64>}, {pipeline_mode = #tpu.pipeline_mode<synchronous>, transform_indices = @transform_1, window_bounds = array<i64: 48, 16>}, {pipeline_mode = #tpu.pipeline_mode<synchronous>, transform_indices = @transform_2, window_bounds = array<i64: 48, 1>}, {pipeline_mode = #tpu.pipeline_mode<synchronous>, transform_indices = @transform_3, window_bounds = array<i64: 16, 16>}, {pipeline_mode = #tpu.pipeline_mode<synchronous>, transform_indices = @transform_4, window_bounds = array<i64: 64, 64>}, {pipeline_mode = #tpu.pipeline_mode<synchronous>, transform_indices = @transform_5, window_bounds = array<i64: 16, 1>}, {pipeline_mode = #tpu.pipeline_mode<synchronous>, transform_indices = @transform_6, window_bounds = array<i64: 4, 4, 16>}, {pipeline_mode = #tpu.pipeline_mode<synchronous>, transform_indices = @transform_7, window_bounds = array<i64: 9, 256>}, {pipeline_mode = #tpu.pipeline_mode<synchronous>, transform_indices = @transform_8, window_bounds = array<i64: 16, 36>}, {pipeline_mode = #tpu.pipeline_mode<synchronous>, transform_indices = @transform_9, window_bounds = array<i64: 16, 1>}, {pipeline_mode = #tpu.pipeline_mode<synchronous>, transform_indices = @transform_10, window_bounds = array<i64: 1, 144>}, {pipeline_mode = #tpu.pipeline_mode<synchronous>, transform_indices = @transform_11, window_bounds = array<i64: 1, 1>}, {transform_indices = @transform_12, window_bounds = array<i64: 1, 4, 256>}, {transform_indices = @transform_13, window_bounds = array<i64: 1, 1, 256>}]} {
    %c0 = arith.constant 0 : index
    %c0_0 = arith.constant 0 : index
    %0 = vector.load %arg2[%c0, %c0_0] : memref<48x16xbf16, #tpu.memory_space<vmem>>, vector<48x16xbf16>
    %c0_1 = arith.constant 0 : index
    %c0_2 = arith.constant 0 : index
    %1 = vector.load %arg3[%c0_1, %c0_2] : memref<48x1xf32, #tpu.memory_space<vmem>>, vector<48x1xf32>
    %c0_3 = arith.constant 0 : index
    %c0_4 = arith.constant 0 : index
    %2 = vector.load %arg4[%c0_3, %c0_4] : memref<16x16xbf16, #tpu.memory_space<vmem>>, vector<16x16xbf16>
    %c0_5 = arith.constant 0 : index
    %c0_6 = arith.constant 0 : index
    %3 = vector.load %arg5[%c0_5, %c0_6] : memref<64x64xbf16, #tpu.memory_space<vmem>>, vector<64x64xbf16>
    %c0_7 = arith.constant 0 : index
    %c0_8 = arith.constant 0 : index
    %4 = vector.load %arg6[%c0_7, %c0_8] : memref<16x1xf32, #tpu.memory_space<vmem>>, vector<16x1xf32>
    %c0_9 = arith.constant 0 : index
    %c0_10 = arith.constant 0 : index
    %c0_11 = arith.constant 0 : index
    %5 = vector.load %arg7[%c0_9, %c0_10, %c0_11] : memref<4x4x16xf32, #tpu.memory_space<vmem>>, vector<4x4x16xf32>
    %c0_12 = arith.constant 0 : index
    %c0_13 = arith.constant 0 : index
    %6 = vector.load %arg8[%c0_12, %c0_13] : memref<9x256xf32, #tpu.memory_space<vmem>>, vector<9x256xf32>
    %c0_14 = arith.constant 0 : index
    %c0_15 = arith.constant 0 : index
    %7 = vector.load %arg9[%c0_14, %c0_15] : memref<16x36xbf16, #tpu.memory_space<vmem>>, vector<16x36xbf16>
    %c0_16 = arith.constant 0 : index
    %c0_17 = arith.constant 0 : index
    %8 = vector.load %arg10[%c0_16, %c0_17] : memref<16x1xf32, #tpu.memory_space<vmem>>, vector<16x1xf32>
    %c0_18 = arith.constant 0 : index
    %c0_19 = arith.constant 0 : index
    %9 = vector.load %arg11[%c0_18, %c0_19] : memref<1x144xbf16, #tpu.memory_space<vmem>>, vector<1x144xbf16>
    %c0_20 = arith.constant 0 : index
    %c0_21 = arith.constant 0 : index
    %10 = vector.load %arg12[%c0_20, %c0_21] : memref<1x1xf32, #tpu.memory_space<vmem>>, vector<1x1xf32>
    %c0_22 = arith.constant 0 : index
    %c0_23 = arith.constant 0 : index
    %c0_24 = arith.constant 0 : index
    %11 = vector.load %arg1[%c0_22, %c0_23, %c0_24] : memref<1x16x64xf32, #tpu.memory_space<vmem>>, vector<1x16x64xf32>
    %12 = vector.shape_cast %11 : vector<1x16x64xf32> to vector<16x64xf32>
    %13 = arith.truncf %12 : vector<16x64xf32> to vector<16x64xbf16>
    %cst = arith.constant dense<0.000000e+00> : vector<48x64xf32>
    %14 = tpu.matmul %0, %13, %cst {dimension_numbers = #tpu.dot_dimension_numbers<[1], [0], [0], [1], [0, 0, 1, 1], [], []>} : vector<48x16xbf16>, vector<16x64xbf16>, vector<48x64xf32> -> vector<48x64xf32>
    %15 = vector.broadcast %1 : vector<48x1xf32> to vector<48x64xf32>
    %16 = arith.addf %14, %15 : vector<48x64xf32>
    %17 = vector.extract_strided_slice %16 {offsets = [0, 0], sizes = [16, 64], strides = [1, 1]} : vector<48x64xf32> to vector<16x64xf32>
    %18 = vector.extract_strided_slice %16 {offsets = [16, 0], sizes = [16, 64], strides = [1, 1]} : vector<48x64xf32> to vector<16x64xf32>
    %19 = vector.extract_strided_slice %16 {offsets = [32, 0], sizes = [16, 64], strides = [1, 1]} : vector<48x64xf32> to vector<16x64xf32>
    %20 = arith.truncf %17 : vector<16x64xf32> to vector<16x64xbf16>
    %21 = arith.truncf %18 : vector<16x64xf32> to vector<16x64xbf16>
    %22 = arith.truncf %19 : vector<16x64xf32> to vector<16x64xbf16>
    %cst_25 = arith.constant dense<0.000000e+00> : vector<64x64xf32>
    %23 = tpu.matmul %21, %22, %cst_25 {dimension_numbers = #tpu.dot_dimension_numbers<[0], [0], [1], [1], [0, 1, 1, 1], [], []>} : vector<16x64xbf16>, vector<16x64xbf16>, vector<64x64xf32> -> vector<64x64xf32>
    %cst_26 = arith.constant dense<0xFF800000> : vector<64xf32>
    %24 = vector.multi_reduction <maximumf>, %23, %cst_26 [1] : vector<64x64xf32> to vector<64xf32>
    %25 = vector.shape_cast %24 : vector<64xf32> to vector<64x1xf32>
    %26 = vector.broadcast %25 : vector<64x1xf32> to vector<64x64xf32>
    %27 = arith.subf %23, %26 : vector<64x64xf32>
    %28 = math.exp %27 : vector<64x64xf32>
    %cst_27 = arith.constant dense<0.000000e+00> : vector<64xf32>
    %29 = vector.multi_reduction <add>, %28, %cst_27 [1] : vector<64x64xf32> to vector<64xf32>
    %30 = vector.shape_cast %29 : vector<64xf32> to vector<64x1xf32>
    %31 = tpu.reciprocal %30 {approx = true} : vector<64x1xf32> -> vector<64x1xf32>
    %32 = vector.broadcast %31 : vector<64x1xf32> to vector<64x64xf32>
    %33 = arith.mulf %28, %32 : vector<64x64xf32>
    %cst_28 = arith.constant dense<0.000000e+00> : vector<16x16xf32>
    %34 = tpu.matmul %21, %22, %cst_28 {dimension_numbers = #tpu.dot_dimension_numbers<[1], [1], [0], [0], [0, 0, 1, 0], [], []>} : vector<16x64xbf16>, vector<16x64xbf16>, vector<16x16xf32> -> vector<16x16xf32>
    %cst_29 = arith.constant dense<0xFF800000> : vector<16xf32>
    %35 = vector.multi_reduction <maximumf>, %34, %cst_29 [1] : vector<16x16xf32> to vector<16xf32>
    %36 = vector.shape_cast %35 : vector<16xf32> to vector<16x1xf32>
    %37 = vector.broadcast %36 : vector<16x1xf32> to vector<16x16xf32>
    %38 = arith.subf %34, %37 : vector<16x16xf32>
    %39 = math.exp %38 : vector<16x16xf32>
    %cst_30 = arith.constant dense<0.000000e+00> : vector<16xf32>
    %40 = vector.multi_reduction <add>, %39, %cst_30 [1] : vector<16x16xf32> to vector<16xf32>
    %41 = vector.shape_cast %40 : vector<16xf32> to vector<16x1xf32>
    %42 = tpu.reciprocal %41 {approx = true} : vector<16x1xf32> -> vector<16x1xf32>
    %43 = vector.broadcast %42 : vector<16x1xf32> to vector<16x16xf32>
    %44 = arith.mulf %39, %43 : vector<16x16xf32>
    %45 = arith.truncf %33 : vector<64x64xf32> to vector<64x64xbf16>
    %cst_31 = arith.constant dense<0.000000e+00> : vector<16x64xf32>
    %46 = tpu.matmul %20, %45, %cst_31 {dimension_numbers = #tpu.dot_dimension_numbers<[1], [1], [0], [0], [0, 0, 1, 0], [], []>} : vector<16x64xbf16>, vector<64x64xbf16>, vector<16x64xf32> -> vector<16x64xf32>
    %47 = arith.truncf %44 : vector<16x16xf32> to vector<16x16xbf16>
    %cst_32 = arith.constant dense<0.000000e+00> : vector<64x16xf32>
    %48 = tpu.matmul %20, %47, %cst_32 {dimension_numbers = #tpu.dot_dimension_numbers<[0], [0], [1], [1], [0, 1, 1, 1], [], []>} : vector<16x64xbf16>, vector<16x16xbf16>, vector<64x16xf32> -> vector<64x16xf32>
    %49 = arith.truncf %46 : vector<16x64xf32> to vector<16x64xbf16>
    %cst_33 = arith.constant dense<0.000000e+00> : vector<16x64xf32>
    %50 = tpu.matmul %2, %49, %cst_33 {dimension_numbers = #tpu.dot_dimension_numbers<[1], [0], [0], [1], [0, 0, 1, 1], [], []>} : vector<16x16xbf16>, vector<16x64xbf16>, vector<16x64xf32> -> vector<16x64xf32>
    %51 = arith.truncf %48 : vector<64x16xf32> to vector<64x16xbf16>
    %cst_34 = arith.constant dense<0.000000e+00> : vector<64x16xf32>
    %52 = tpu.matmul %3, %51, %cst_34 {dimension_numbers = #tpu.dot_dimension_numbers<[1], [0], [0], [1], [0, 0, 1, 1], [], []>} : vector<64x64xbf16>, vector<64x16xbf16>, vector<64x16xf32> -> vector<64x16xf32>
    %53 = vector.extract_strided_slice %52 {offsets = [0, 0], sizes = [16, 16], strides = [1, 1]} : vector<64x16xf32> to vector<16x16xf32>
    %54 = vector.extract_strided_slice %52 {offsets = [16, 0], sizes = [16, 16], strides = [1, 1]} : vector<64x16xf32> to vector<16x16xf32>
    %55 = vector.extract_strided_slice %52 {offsets = [32, 0], sizes = [16, 16], strides = [1, 1]} : vector<64x16xf32> to vector<16x16xf32>
    %56 = vector.extract_strided_slice %52 {offsets = [48, 0], sizes = [16, 16], strides = [1, 1]} : vector<64x16xf32> to vector<16x16xf32>
    %57 = tpu.concatenate %53, %54, %55, %56 in 1 : vector<16x16xf32>, vector<16x16xf32>, vector<16x16xf32>, vector<16x16xf32> -> vector<16x64xf32>
    %58 = vector.broadcast %4 : vector<16x1xf32> to vector<16x64xf32>
    %59 = arith.addf %12, %58 : vector<16x64xf32>
    %60 = arith.addf %59, %50 : vector<16x64xf32>
    %61 = arith.addf %60, %57 : vector<16x64xf32>
    %62 = vector.extract_strided_slice %5 {offsets = [0, 0, 0], sizes = [1, 4, 16], strides = [1, 1, 1]} : vector<4x4x16xf32> to vector<1x4x16xf32>
    %63 = vector.shape_cast %62 : vector<1x4x16xf32> to vector<4x16xf32>
    %cst_35 = arith.constant dense<0.000000e+00> : vector<4x64xf32>
    %64 = tpu.matmul %63, %61, %cst_35 {dimension_numbers = #tpu.dot_dimension_numbers<[1], [0], [0], [1], [0, 0, 1, 1], [], []>} : vector<4x16xf32>, vector<16x64xf32>, vector<4x64xf32> -> vector<4x64xf32>
    %65 = vector.extract_strided_slice %5 {offsets = [1, 0, 0], sizes = [1, 4, 16], strides = [1, 1, 1]} : vector<4x4x16xf32> to vector<1x4x16xf32>
    %66 = vector.shape_cast %65 : vector<1x4x16xf32> to vector<4x16xf32>
    %cst_36 = arith.constant dense<0.000000e+00> : vector<4x64xf32>
    %67 = tpu.matmul %66, %61, %cst_36 {dimension_numbers = #tpu.dot_dimension_numbers<[1], [0], [0], [1], [0, 0, 1, 1], [], []>} : vector<4x16xf32>, vector<16x64xf32>, vector<4x64xf32> -> vector<4x64xf32>
    %68 = vector.extract_strided_slice %5 {offsets = [2, 0, 0], sizes = [1, 4, 16], strides = [1, 1, 1]} : vector<4x4x16xf32> to vector<1x4x16xf32>
    %69 = vector.shape_cast %68 : vector<1x4x16xf32> to vector<4x16xf32>
    %cst_37 = arith.constant dense<0.000000e+00> : vector<4x64xf32>
    %70 = tpu.matmul %69, %61, %cst_37 {dimension_numbers = #tpu.dot_dimension_numbers<[1], [0], [0], [1], [0, 0, 1, 1], [], []>} : vector<4x16xf32>, vector<16x64xf32>, vector<4x64xf32> -> vector<4x64xf32>
    %71 = vector.extract_strided_slice %5 {offsets = [3, 0, 0], sizes = [1, 4, 16], strides = [1, 1, 1]} : vector<4x4x16xf32> to vector<1x4x16xf32>
    %72 = vector.shape_cast %71 : vector<1x4x16xf32> to vector<4x16xf32>
    %cst_38 = arith.constant dense<0.000000e+00> : vector<4x64xf32>
    %73 = tpu.matmul %72, %61, %cst_38 {dimension_numbers = #tpu.dot_dimension_numbers<[1], [0], [0], [1], [0, 0, 1, 1], [], []>} : vector<4x16xf32>, vector<16x64xf32>, vector<4x64xf32> -> vector<4x64xf32>
    %74 = tpu.concatenate %64, %67, %70, %73 in 1 : vector<4x64xf32>, vector<4x64xf32>, vector<4x64xf32>, vector<4x64xf32> -> vector<4x256xf32>
    %c0_39 = arith.constant 0 : index
    %c0_40 = arith.constant 0 : index
    %c0_41 = arith.constant 0 : index
    %75 = vector.load %arg13[%c0_39, %c0_40, %c0_41] : memref<1x4x256xf32, #tpu.memory_space<vmem>>, vector<1x4x256xf32>
    %76 = vector.shape_cast %75 : vector<1x4x256xf32> to vector<4x256xf32>
    %77 = vector.shape_cast %74 : vector<4x256xf32> to vector<1x4x256xf32>
    tpu.vector_store %arg13[%c0_39, %c0_40, %c0_41], %77 {strides = array<i32>} : memref<1x4x256xf32, #tpu.memory_space<vmem>>, vector<1x4x256xf32>,
    %c17_i32 = arith.constant 17 : i32
    %78 = tpu.dynamic_rotate %74 by %c17_i32 dim 1 : vector<4x256xf32>, i32 -> vector<4x256xf32>
    %79 = vector.extract_strided_slice %6 {offsets = [0, 0], sizes = [1, 256], strides = [1, 1]} : vector<9x256xf32> to vector<1x256xf32>
    %80 = vector.broadcast %79 : vector<1x256xf32> to vector<4x256xf32>
    %81 = arith.mulf %78, %80 : vector<4x256xf32>
    %c0_42 = arith.constant 0 : index
    %c0_43 = arith.constant 0 : index
    %82 = vector.load %arg15[%c0_42, %c0_43] : memref<36x256xf32, #tpu.memory_space<vmem>>, vector<4x256xf32>
    tpu.vector_store %arg15[%c0_42, %c0_43], %81 {strides = array<i32>} : memref<36x256xf32, #tpu.memory_space<vmem>>, vector<4x256xf32>,
    %c16_i32 = arith.constant 16 : i32
    %83 = tpu.dynamic_rotate %74 by %c16_i32 dim 1 : vector<4x256xf32>, i32 -> vector<4x256xf32>
    %84 = vector.extract_strided_slice %6 {offsets = [1, 0], sizes = [1, 256], strides = [1, 1]} : vector<9x256xf32> to vector<1x256xf32>
    %85 = vector.broadcast %84 : vector<1x256xf32> to vector<4x256xf32>
    %86 = arith.mulf %83, %85 : vector<4x256xf32>
    %c4 = arith.constant 4 : index
    %c0_44 = arith.constant 0 : index
    %87 = vector.load %arg15[%c4, %c0_44] : memref<36x256xf32, #tpu.memory_space<vmem>>, vector<4x256xf32>
    tpu.vector_store %arg15[%c4, %c0_44], %86 {strides = array<i32>} : memref<36x256xf32, #tpu.memory_space<vmem>>, vector<4x256xf32>,
    %c15_i32 = arith.constant 15 : i32
    %88 = tpu.dynamic_rotate %74 by %c15_i32 dim 1 : vector<4x256xf32>, i32 -> vector<4x256xf32>
    %89 = vector.extract_strided_slice %6 {offsets = [2, 0], sizes = [1, 256], strides = [1, 1]} : vector<9x256xf32> to vector<1x256xf32>
    %90 = vector.broadcast %89 : vector<1x256xf32> to vector<4x256xf32>
    %91 = arith.mulf %88, %90 : vector<4x256xf32>
    %c8 = arith.constant 8 : index
    %c0_45 = arith.constant 0 : index
    %92 = vector.load %arg15[%c8, %c0_45] : memref<36x256xf32, #tpu.memory_space<vmem>>, vector<4x256xf32>
    tpu.vector_store %arg15[%c8, %c0_45], %91 {strides = array<i32>} : memref<36x256xf32, #tpu.memory_space<vmem>>, vector<4x256xf32>,
    %c1_i32 = arith.constant 1 : i32
    %93 = tpu.dynamic_rotate %74 by %c1_i32 dim 1 : vector<4x256xf32>, i32 -> vector<4x256xf32>
    %94 = vector.extract_strided_slice %6 {offsets = [3, 0], sizes = [1, 256], strides = [1, 1]} : vector<9x256xf32> to vector<1x256xf32>
    %95 = vector.broadcast %94 : vector<1x256xf32> to vector<4x256xf32>
    %96 = arith.mulf %93, %95 : vector<4x256xf32>
    %c12 = arith.constant 12 : index
    %c0_46 = arith.constant 0 : index
    %97 = vector.load %arg15[%c12, %c0_46] : memref<36x256xf32, #tpu.memory_space<vmem>>, vector<4x256xf32>
    tpu.vector_store %arg15[%c12, %c0_46], %96 {strides = array<i32>} : memref<36x256xf32, #tpu.memory_space<vmem>>, vector<4x256xf32>,
    %98 = vector.extract_strided_slice %6 {offsets = [4, 0], sizes = [1, 256], strides = [1, 1]} : vector<9x256xf32> to vector<1x256xf32>
    %99 = vector.broadcast %98 : vector<1x256xf32> to vector<4x256xf32>
    %100 = arith.mulf %74, %99 : vector<4x256xf32>
    %c16 = arith.constant 16 : index
    %c0_47 = arith.constant 0 : index
    %101 = vector.load %arg15[%c16, %c0_47] : memref<36x256xf32, #tpu.memory_space<vmem>>, vector<4x256xf32>
    tpu.vector_store %arg15[%c16, %c0_47], %100 {strides = array<i32>} : memref<36x256xf32, #tpu.memory_space<vmem>>, vector<4x256xf32>,
    %c255_i32 = arith.constant 255 : i32
    %102 = tpu.dynamic_rotate %74 by %c255_i32 dim 1 : vector<4x256xf32>, i32 -> vector<4x256xf32>
    %103 = vector.extract_strided_slice %6 {offsets = [5, 0], sizes = [1, 256], strides = [1, 1]} : vector<9x256xf32> to vector<1x256xf32>
    %104 = vector.broadcast %103 : vector<1x256xf32> to vector<4x256xf32>
    %105 = arith.mulf %102, %104 : vector<4x256xf32>
    %c20 = arith.constant 20 : index
    %c0_48 = arith.constant 0 : index
    %106 = vector.load %arg15[%c20, %c0_48] : memref<36x256xf32, #tpu.memory_space<vmem>>, vector<4x256xf32>
    tpu.vector_store %arg15[%c20, %c0_48], %105 {strides = array<i32>} : memref<36x256xf32, #tpu.memory_space<vmem>>, vector<4x256xf32>,
    %c241_i32 = arith.constant 241 : i32
    %107 = tpu.dynamic_rotate %74 by %c241_i32 dim 1 : vector<4x256xf32>, i32 -> vector<4x256xf32>
    %108 = vector.extract_strided_slice %6 {offsets = [6, 0], sizes = [1, 256], strides = [1, 1]} : vector<9x256xf32> to vector<1x256xf32>
    %109 = vector.broadcast %108 : vector<1x256xf32> to vector<4x256xf32>
    %110 = arith.mulf %107, %109 : vector<4x256xf32>
    %c24 = arith.constant 24 : index
    %c0_49 = arith.constant 0 : index
    %111 = vector.load %arg15[%c24, %c0_49] : memref<36x256xf32, #tpu.memory_space<vmem>>, vector<4x256xf32>
    tpu.vector_store %arg15[%c24, %c0_49], %110 {strides = array<i32>} : memref<36x256xf32, #tpu.memory_space<vmem>>, vector<4x256xf32>,
    %c240_i32 = arith.constant 240 : i32
    %112 = tpu.dynamic_rotate %74 by %c240_i32 dim 1 : vector<4x256xf32>, i32 -> vector<4x256xf32>
    %113 = vector.extract_strided_slice %6 {offsets = [7, 0], sizes = [1, 256], strides = [1, 1]} : vector<9x256xf32> to vector<1x256xf32>
    %114 = vector.broadcast %113 : vector<1x256xf32> to vector<4x256xf32>
    %115 = arith.mulf %112, %114 : vector<4x256xf32>
    %c28 = arith.constant 28 : index
    %c0_50 = arith.constant 0 : index
    %116 = vector.load %arg15[%c28, %c0_50] : memref<36x256xf32, #tpu.memory_space<vmem>>, vector<4x256xf32>
    tpu.vector_store %arg15[%c28, %c0_50], %115 {strides = array<i32>} : memref<36x256xf32, #tpu.memory_space<vmem>>, vector<4x256xf32>,
    %c239_i32 = arith.constant 239 : i32
    %117 = tpu.dynamic_rotate %74 by %c239_i32 dim 1 : vector<4x256xf32>, i32 -> vector<4x256xf32>
    %118 = vector.extract_strided_slice %6 {offsets = [8, 0], sizes = [1, 256], strides = [1, 1]} : vector<9x256xf32> to vector<1x256xf32>
    %119 = vector.broadcast %118 : vector<1x256xf32> to vector<4x256xf32>
    %120 = arith.mulf %117, %119 : vector<4x256xf32>
    %c32 = arith.constant 32 : index
    %c0_51 = arith.constant 0 : index
    %121 = vector.load %arg15[%c32, %c0_51] : memref<36x256xf32, #tpu.memory_space<vmem>>, vector<4x256xf32>
    tpu.vector_store %arg15[%c32, %c0_51], %120 {strides = array<i32>} : memref<36x256xf32, #tpu.memory_space<vmem>>, vector<4x256xf32>,
    %c0_52 = arith.constant 0 : index
    %c0_53 = arith.constant 0 : index
    %122 = vector.load %arg15[%c0_52, %c0_53] : memref<36x256xf32, #tpu.memory_space<vmem>>, vector<36x256xf32>
    %123 = arith.truncf %122 : vector<36x256xf32> to vector<36x256xbf16>
    %cst_54 = arith.constant dense<0.000000e+00> : vector<16x256xf32>
    %124 = tpu.matmul %7, %123, %cst_54 {dimension_numbers = #tpu.dot_dimension_numbers<[1], [0], [0], [1], [0, 0, 1, 1], [], []>} : vector<16x36xbf16>, vector<36x256xbf16>, vector<16x256xf32> -> vector<16x256xf32>
    %125 = vector.broadcast %8 : vector<16x1xf32> to vector<16x256xf32>
    %126 = arith.addf %124, %125 : vector<16x256xf32>
    %cst_55 = arith.constant 0.000000e+00 : f32
    %127 = vector.broadcast %cst_55 : f32 to vector<16x256xf32>
    %128 = arith.maximumf %126, %127 : vector<16x256xf32>
    %c17_i32_56 = arith.constant 17 : i32
    %129 = tpu.dynamic_rotate %128 by %c17_i32_56 dim 1 : vector<16x256xf32>, i32 -> vector<16x256xf32>
    %130 = vector.extract_strided_slice %6 {offsets = [0, 0], sizes = [1, 256], strides = [1, 1]} : vector<9x256xf32> to vector<1x256xf32>
    %131 = vector.broadcast %130 : vector<1x256xf32> to vector<16x256xf32>
    %132 = arith.mulf %129, %131 : vector<16x256xf32>
    %c0_57 = arith.constant 0 : index
    %c0_58 = arith.constant 0 : index
    %133 = vector.load %arg16[%c0_57, %c0_58] : memref<144x256xf32, #tpu.memory_space<vmem>>, vector<16x256xf32>
    tpu.vector_store %arg16[%c0_57, %c0_58], %132 {strides = array<i32>} : memref<144x256xf32, #tpu.memory_space<vmem>>, vector<16x256xf32>,
    %c16_i32_59 = arith.constant 16 : i32
    %134 = tpu.dynamic_rotate %128 by %c16_i32_59 dim 1 : vector<16x256xf32>, i32 -> vector<16x256xf32>
    %135 = vector.extract_strided_slice %6 {offsets = [1, 0], sizes = [1, 256], strides = [1, 1]} : vector<9x256xf32> to vector<1x256xf32>
    %136 = vector.broadcast %135 : vector<1x256xf32> to vector<16x256xf32>
    %137 = arith.mulf %134, %136 : vector<16x256xf32>
    %c16_60 = arith.constant 16 : index
    %c0_61 = arith.constant 0 : index
    %138 = vector.load %arg16[%c16_60, %c0_61] : memref<144x256xf32, #tpu.memory_space<vmem>>, vector<16x256xf32>
    tpu.vector_store %arg16[%c16_60, %c0_61], %137 {strides = array<i32>} : memref<144x256xf32, #tpu.memory_space<vmem>>, vector<16x256xf32>,
    %c15_i32_62 = arith.constant 15 : i32
    %139 = tpu.dynamic_rotate %128 by %c15_i32_62 dim 1 : vector<16x256xf32>, i32 -> vector<16x256xf32>
    %140 = vector.extract_strided_slice %6 {offsets = [2, 0], sizes = [1, 256], strides = [1, 1]} : vector<9x256xf32> to vector<1x256xf32>
    %141 = vector.broadcast %140 : vector<1x256xf32> to vector<16x256xf32>
    %142 = arith.mulf %139, %141 : vector<16x256xf32>
    %c32_63 = arith.constant 32 : index
    %c0_64 = arith.constant 0 : index
    %143 = vector.load %arg16[%c32_63, %c0_64] : memref<144x256xf32, #tpu.memory_space<vmem>>, vector<16x256xf32>
    tpu.vector_store %arg16[%c32_63, %c0_64], %142 {strides = array<i32>} : memref<144x256xf32, #tpu.memory_space<vmem>>, vector<16x256xf32>,
    %c1_i32_65 = arith.constant 1 : i32
    %144 = tpu.dynamic_rotate %128 by %c1_i32_65 dim 1 : vector<16x256xf32>, i32 -> vector<16x256xf32>
    %145 = vector.extract_strided_slice %6 {offsets = [3, 0], sizes = [1, 256], strides = [1, 1]} : vector<9x256xf32> to vector<1x256xf32>
    %146 = vector.broadcast %145 : vector<1x256xf32> to vector<16x256xf32>
    %147 = arith.mulf %144, %146 : vector<16x256xf32>
    %c48 = arith.constant 48 : index
    %c0_66 = arith.constant 0 : index
    %148 = vector.load %arg16[%c48, %c0_66] : memref<144x256xf32, #tpu.memory_space<vmem>>, vector<16x256xf32>
    tpu.vector_store %arg16[%c48, %c0_66], %147 {strides = array<i32>} : memref<144x256xf32, #tpu.memory_space<vmem>>, vector<16x256xf32>,
    %149 = vector.extract_strided_slice %6 {offsets = [4, 0], sizes = [1, 256], strides = [1, 1]} : vector<9x256xf32> to vector<1x256xf32>
    %150 = vector.broadcast %149 : vector<1x256xf32> to vector<16x256xf32>
    %151 = arith.mulf %128, %150 : vector<16x256xf32>
    %c64 = arith.constant 64 : index
    %c0_67 = arith.constant 0 : index
    %152 = vector.load %arg16[%c64, %c0_67] : memref<144x256xf32, #tpu.memory_space<vmem>>, vector<16x256xf32>
    tpu.vector_store %arg16[%c64, %c0_67], %151 {strides = array<i32>} : memref<144x256xf32, #tpu.memory_space<vmem>>, vector<16x256xf32>,
    %c255_i32_68 = arith.constant 255 : i32
    %153 = tpu.dynamic_rotate %128 by %c255_i32_68 dim 1 : vector<16x256xf32>, i32 -> vector<16x256xf32>
    %154 = vector.extract_strided_slice %6 {offsets = [5, 0], sizes = [1, 256], strides = [1, 1]} : vector<9x256xf32> to vector<1x256xf32>
    %155 = vector.broadcast %154 : vector<1x256xf32> to vector<16x256xf32>
    %156 = arith.mulf %153, %155 : vector<16x256xf32>
    %c80 = arith.constant 80 : index
    %c0_69 = arith.constant 0 : index
    %157 = vector.load %arg16[%c80, %c0_69] : memref<144x256xf32, #tpu.memory_space<vmem>>, vector<16x256xf32>
    tpu.vector_store %arg16[%c80, %c0_69], %156 {strides = array<i32>} : memref<144x256xf32, #tpu.memory_space<vmem>>, vector<16x256xf32>,
    %c241_i32_70 = arith.constant 241 : i32
    %158 = tpu.dynamic_rotate %128 by %c241_i32_70 dim 1 : vector<16x256xf32>, i32 -> vector<16x256xf32>
    %159 = vector.extract_strided_slice %6 {offsets = [6, 0], sizes = [1, 256], strides = [1, 1]} : vector<9x256xf32> to vector<1x256xf32>
    %160 = vector.broadcast %159 : vector<1x256xf32> to vector<16x256xf32>
    %161 = arith.mulf %158, %160 : vector<16x256xf32>
    %c96 = arith.constant 96 : index
    %c0_71 = arith.constant 0 : index
    %162 = vector.load %arg16[%c96, %c0_71] : memref<144x256xf32, #tpu.memory_space<vmem>>, vector<16x256xf32>
    tpu.vector_store %arg16[%c96, %c0_71], %161 {strides = array<i32>} : memref<144x256xf32, #tpu.memory_space<vmem>>, vector<16x256xf32>,
    %c240_i32_72 = arith.constant 240 : i32
    %163 = tpu.dynamic_rotate %128 by %c240_i32_72 dim 1 : vector<16x256xf32>, i32 -> vector<16x256xf32>
    %164 = vector.extract_strided_slice %6 {offsets = [7, 0], sizes = [1, 256], strides = [1, 1]} : vector<9x256xf32> to vector<1x256xf32>
    %165 = vector.broadcast %164 : vector<1x256xf32> to vector<16x256xf32>
    %166 = arith.mulf %163, %165 : vector<16x256xf32>
    %c112 = arith.constant 112 : index
    %c0_73 = arith.constant 0 : index
    %167 = vector.load %arg16[%c112, %c0_73] : memref<144x256xf32, #tpu.memory_space<vmem>>, vector<16x256xf32>
    tpu.vector_store %arg16[%c112, %c0_73], %166 {strides = array<i32>} : memref<144x256xf32, #tpu.memory_space<vmem>>, vector<16x256xf32>,
    %c239_i32_74 = arith.constant 239 : i32
    %168 = tpu.dynamic_rotate %128 by %c239_i32_74 dim 1 : vector<16x256xf32>, i32 -> vector<16x256xf32>
    %169 = vector.extract_strided_slice %6 {offsets = [8, 0], sizes = [1, 256], strides = [1, 1]} : vector<9x256xf32> to vector<1x256xf32>
    %170 = vector.broadcast %169 : vector<1x256xf32> to vector<16x256xf32>
    %171 = arith.mulf %168, %170 : vector<16x256xf32>
    %c128 = arith.constant 128 : index
    %c0_75 = arith.constant 0 : index
    %172 = vector.load %arg16[%c128, %c0_75] : memref<144x256xf32, #tpu.memory_space<vmem>>, vector<16x256xf32>
    tpu.vector_store %arg16[%c128, %c0_75], %171 {strides = array<i32>} : memref<144x256xf32, #tpu.memory_space<vmem>>, vector<16x256xf32>,
    %c0_76 = arith.constant 0 : index
    %c0_77 = arith.constant 0 : index
    %173 = vector.load %arg16[%c0_76, %c0_77] : memref<144x256xf32, #tpu.memory_space<vmem>>, vector<144x256xf32>
    %174 = arith.truncf %173 : vector<144x256xf32> to vector<144x256xbf16>
    %cst_78 = arith.constant dense<0.000000e+00> : vector<1x256xf32>
    %175 = tpu.matmul %9, %174, %cst_78 {dimension_numbers = #tpu.dot_dimension_numbers<[1], [0], [0], [1], [0, 0, 1, 1], [], []>} : vector<1x144xbf16>, vector<144x256xbf16>, vector<1x256xf32> -> vector<1x256xf32>
    %176 = vector.broadcast %10 : vector<1x1xf32> to vector<1x256xf32>
    %177 = arith.addf %175, %176 : vector<1x256xf32>
    %c0_79 = arith.constant 0 : index
    %c0_80 = arith.constant 0 : index
    %c0_81 = arith.constant 0 : index
    %178 = vector.load %arg14[%c0_79, %c0_80, %c0_81] : memref<1x1x256xf32, #tpu.memory_space<vmem>>, vector<1x1x256xf32>
    %179 = vector.shape_cast %178 : vector<1x1x256xf32> to vector<1x256xf32>
    %180 = vector.shape_cast %177 : vector<1x256xf32> to vector<1x1x256xf32>
    tpu.vector_store %arg14[%c0_79, %c0_80, %c0_81], %180 {strides = array<i32>} : memref<1x1x256xf32, #tpu.memory_space<vmem>>, vector<1x1x256xf32>,
    return
  }
  func.func @transform_0(%arg0: i32) -> (i32, i32, i32) {
    %c0_i32 = arith.constant 0 : i32
    %c0_i32_0 = arith.constant 0 : i32
    %c0_i32_1 = arith.constant 0 : i32
    return %arg0, %c0_i32, %c0_i32_0 : i32, i32, i32
  }
  func.func @transform_1(%arg0: i32) -> (i32, i32) {
    %c0_i32 = arith.constant 0 : i32
    %c0_i32_0 = arith.constant 0 : i32
    %c0_i32_1 = arith.constant 0 : i32
    return %c0_i32, %c0_i32_0 : i32, i32
  }
  func.func @transform_2(%arg0: i32) -> (i32, i32) {
    %c0_i32 = arith.constant 0 : i32
    %c0_i32_0 = arith.constant 0 : i32
    %c0_i32_1 = arith.constant 0 : i32
    return %c0_i32, %c0_i32_0 : i32, i32
  }
  func.func @transform_3(%arg0: i32) -> (i32, i32) {
    %c0_i32 = arith.constant 0 : i32
    %c0_i32_0 = arith.constant 0 : i32
    %c0_i32_1 = arith.constant 0 : i32
    return %c0_i32, %c0_i32_0 : i32, i32
  }
  func.func @transform_4(%arg0: i32) -> (i32, i32) {
    %c0_i32 = arith.constant 0 : i32
    %c0_i32_0 = arith.constant 0 : i32
    %c0_i32_1 = arith.constant 0 : i32
    return %c0_i32, %c0_i32_0 : i32, i32
  }
  func.func @transform_5(%arg0: i32) -> (i32, i32) {
    %c0_i32 = arith.constant 0 : i32
    %c0_i32_0 = arith.constant 0 : i32
    %c0_i32_1 = arith.constant 0 : i32
    return %c0_i32, %c0_i32_0 : i32, i32
  }
  func.func @transform_6(%arg0: i32) -> (i32, i32, i32) {
    %c0_i32 = arith.constant 0 : i32
    %c0_i32_0 = arith.constant 0 : i32
    %c0_i32_1 = arith.constant 0 : i32
    %c0_i32_2 = arith.constant 0 : i32
    return %c0_i32, %c0_i32_0, %c0_i32_1 : i32, i32, i32
  }
  func.func @transform_7(%arg0: i32) -> (i32, i32) {
    %c0_i32 = arith.constant 0 : i32
    %c0_i32_0 = arith.constant 0 : i32
    %c0_i32_1 = arith.constant 0 : i32
    return %c0_i32, %c0_i32_0 : i32, i32
  }
  func.func @transform_8(%arg0: i32) -> (i32, i32) {
    %c0_i32 = arith.constant 0 : i32
    %c0_i32_0 = arith.constant 0 : i32
    %c0_i32_1 = arith.constant 0 : i32
    return %c0_i32, %c0_i32_0 : i32, i32
  }
  func.func @transform_9(%arg0: i32) -> (i32, i32) {
    %c0_i32 = arith.constant 0 : i32
    %c0_i32_0 = arith.constant 0 : i32
    %c0_i32_1 = arith.constant 0 : i32
    return %c0_i32, %c0_i32_0 : i32, i32
  }
  func.func @transform_10(%arg0: i32) -> (i32, i32) {
    %c0_i32 = arith.constant 0 : i32
    %c0_i32_0 = arith.constant 0 : i32
    %c0_i32_1 = arith.constant 0 : i32
    return %c0_i32, %c0_i32_0 : i32, i32
  }
  func.func @transform_11(%arg0: i32) -> (i32, i32) {
    %c0_i32 = arith.constant 0 : i32
    %c0_i32_0 = arith.constant 0 : i32
    %c0_i32_1 = arith.constant 0 : i32
    return %c0_i32, %c0_i32_0 : i32, i32
  }
  func.func @transform_12(%arg0: i32) -> (i32, i32, i32) {
    %c0_i32 = arith.constant 0 : i32
    %c0_i32_0 = arith.constant 0 : i32
    %c0_i32_1 = arith.constant 0 : i32
    return %arg0, %c0_i32, %c0_i32_0 : i32, i32, i32
  }
  func.func @transform_13(%arg0: i32) -> (i32, i32, i32) {
    %c0_i32 = arith.constant 0 : i32
    %c0_i32_0 = arith.constant 0 : i32
    %c0_i32_1 = arith.constant 0 : i32
    return %arg0, %c0_i32, %c0_i32_0 : i32, i32, i32
  }
}

</mosaic_0001>

<bundles_post_ra>
// kernel: tpu_custom_call.1
= control target key start
LH: loop header
LB: loop body
LE: loop exit
PB: predicated region body
PF: predicated region fallthrough
CT: control target
= control target key end

     0   :  { %s3472_s0 = inlined_call_operand.vmem [shape: f32[2,16,64], index: 0, kind: input, shape index: {}]   ;;  %s3473_s1 = inlined_call_operand.vmem [shape: bf16[48,16], index: 1, kind: input, shape index: {}]   ;;  %s3474_s2 = inlined_call_operand.vmem [shape: f32[48,1], index: 2, kind: input, shape index: {}]   ;;  %s3475_s3 = inlined_call_operand.vmem [shape: bf16[16,16], index: 3, kind: input, shape index: {}]   ;;  %s3476_s4 = inlined_call_operand.vmem [shape: bf16[64,64], index: 4, kind: input, shape index: {}]   ;;  %s3477_s5 = inlined_call_operand.vmem [shape: f32[16,1], index: 5, kind: input, shape index: {}]   ;;  %s3478_s6 = inlined_call_operand.vmem [shape: f32[4,4,16], index: 6, kind: input, shape index: {}]   ;;  %s3479_s7 = inlined_call_operand.vmem [shape: f32[9,256], index: 7, kind: input, shape index: {}]   ;;  %s3480_s8 = inlined_call_operand.vmem [shape: bf16[16,36], index: 8, kind: input, shape index: {}]   ;;  %s3481_s9 = inlined_call_operand.vmem [shape: f32[16,1], index: 9, kind: input, shape index: {}]   ;;  %s3482_s10 = inlined_call_operand.vmem [shape: bf16[1,144], index: 10, kind: input, shape index: {}]   ;;  %s3483_s11 = inlined_call_operand.<no memory space> [shape: f32[1,1], index: 11, kind: input, shape index: {}]   ;;  %s3484_s12 = inlined_call_operand.hbm [shape: f32[2,4,256], index: 12, kind: output, shape index: {0}]   ;;  %s3485_s13 = inlined_call_operand.hbm [shape: f32[2,1,256], index: 13, kind: output, shape index: {1}]  }
   0x1   :  { %3493 = sst [smem:[#allocation13_spill]] %s3472_s0  ;;  %v19_v0 = vstv %s3483_s11 }
   0x2   :  { %20 = vst [vmem:[#allocation4] sm:$0x1] %v19_v0 }
   0x3   :  { %21 = vsyncpa [#allocation6], 0 }
   0x4   :  { %23 = vsyncpa [#allocation6 + $0x1], 0 }
   0x5   :  { %24 = vsyncpa [#allocation8], 0 }
   0x6   :  { %26 = vsyncpa [#allocation8 + $0x1], 0  ;;  %s2757_s27 = smov 0   ;;  %s2759_s28 = smov 0  }
   0x7   :  { %s2761_s29 = smov 0   ;;  %s2763_s30 = smov 0  }
   0x8 LB: > { %3494 = sst [smem:[#allocation11_spill]] %s2660_s29  ;;  %s2778_s11 = sadd.s32 4294967295, %s2664_s30   ;;  %s2664_s30 = sphi %s2763_s30, %s3506_s30   ;;  %s2660_s29 = sphi %s2761_s29, %s3503_s29   ;;  %s2656_s28 = sphi %s2759_s28, %s3505_s28   ;;  %s2652_s27 = sphi %s2757_s27, %s3504_s27  }
   0x9   : > { %s2246_s14 = sadd.s32 4294967294, %s2664_s30   ;;  %s2782_s15 = sadd.s32 1, %s2664_s30  }
   0xa   : > { %s296_s16 = sadd.s32 1, %s2660_s29  ;;  %s293_s17 = ssub.s32 %s2664_s30, %s2782_s15 }
   0xb   : > { %p306_p0 = scmp.ne.s32.totalorder %s2660_s29, %s2656_s28  ;;  %p294_p1 = scmp.eq.s32.totalorder %s293_s17, 0 }
   0xc   : > { %p307_p2 = scmp.eq.s32.totalorder %s2778_s11, 1  ;;  %p312_p3 = scmp.ne.s32.totalorder %s2656_s28, %s2652_s27 }
   0xd   : > { %p313_p4 = scmp.eq.s32.totalorder %s2246_s14, 1  ;;  %p2249_p7 = scmp.ge.s32.totalorder %s2664_s30, 1 }
   0xe   : > { %s2793_s18 = scalar_select %p294_p1, %s2660_s29, %s296_s16  }
   0xf   : > { %p2795_p5 = por %p307_p2, %p306_p0  ;;  %p2799_p6 = por %p313_p4, %p312_p3 }
  0x10   : > { %3495 = sst [smem:[#allocation12_spill]] %s2793_s18  ;;  %p398_p8 = scmp.lt.s32.totalorder %s2664_s30, 3 }
  0x12   : > { %p399_p9 = pnand %p2249_p7, %p398_p8 }
  0x13   : > { %p447_p10 = scmp.lt.s32.totalorder (!%p399_p9), %s2778_s11, 1  ;;  %v2666_v1 = vmov (!%p399_p9), 0.0   ;;  %vm2667_vm0 = vmmov (!%p399_p9), 0   ;;  %v461_v2 = vld [vmem:[%s3474_s2 + $0x10] sm:$0xff] (!%p399_p9)  ;;  %v2668_v3 = vmov (!%p399_p9), 0   ;;  %v462_v4 = vld [vmem:[%s3474_s2 + $0x18] sm:$0xff] (!%p399_p9) }
  0x14   : > { %402 = sbr.rel (%p399_p9) target bundleno = 2640 (0xa50), region = 68  ;;  %2345 = vmatprep.subr.bf16.mxu0 (!%p399_p9), %v2666_v1  ;;  %2347 = vmatprep.mubr.msk.bf16.mxu0 (!%p399_p9), %vm2667_vm0, %v2666_v1  ;;  %v463_v5 = vld [vmem:[%s3474_s2 + $0x20] sm:$0xff] (!%p399_p9)  ;;  %v464_v6 = vld [vmem:[%s3474_s2 + $0x28] sm:$0xff] (!%p399_p9)  ;;  %s3498_s0 = sld [smem:[#allocation13_spill]] (!%p399_p9)  ;;  %vm539_vm1 = vcmask (!%p399_p9), 130048   ;;  %v2523_v12 = vld [vmem:[%s3473_s1 + $0x10] sm:$0xff] (!%p399_p9)  }
  0x15   : > { %2519 = vset.pattern.permute.xlu0 (!%p399_p9), %v2668_v3  ;;  %2520 = vset.pattern.permute.xlu1 (!%p399_p9), %v2668_v3  ;;  %v2521_v9 = vld [vmem:[%s3473_s1] sm:$0xff] (!%p399_p9)   ;;  %v2522_v11 = vld [vmem:[%s3473_s1 + $0x8] sm:$0xff] (!%p399_p9)   ;;  %vm702_vm2 = vcmask (!%p399_p9), 523264   ;;  %s2671_s18 = smov (!%p399_p9), 32   ;;  %s2672_s25 = smov (!%p399_p9), 48   ;;  %vm1191_vm3 = vcmask (!%p399_p9), 261120  }
  0x16   : > { %506 = vperm.xlu0 (!%p399_p9), %2519, %v461_v2   ;;  %516 = vperm.xlu1 (!%p399_p9), %2520, %v463_v5   ;;  %v460_v60 = vld [vmem:[%s3474_s2 + $0x8] sm:$0xff] (!%p399_p9)  ;;  %v459_v61 = vld [vmem:[%s3474_s2] sm:$0xff] (!%p399_p9)  ;;  %vm1194_vm4 = vcmask (!%p399_p9), 392192   ;;  %s3050_s17 = sand.u32 (!%p399_p9), 1, %s2656_s28   ;;  %s3487_s22 = smov (!%p399_p9), 1   ;;  %vm1745_vm13 = vcmask (!%p399_p9), 1041408  }
  0x17   : > { %s2250_s23 = sshll.u32 (!%p399_p9), %s3050_s17, 3  ;;  %s2675_s24 = smov (!%p399_p9), 17   ;;  %vm1741_vm14 = vcmask (!%p399_p9), 293888  }
  0x18   : > { %s2679_s14 = smov (!%p399_p9), 113   ;;  %s2680_s16 = smov (!%p399_p9), 111  }
  0x1a   : > { %511 = vperm.xlu0 (!%p399_p9), %2519, %v462_v4   ;;  %521 = vperm.xlu1 (!%p399_p9), %2520, %v464_v6  }
  0x1b   : > { %s448_s21 = scalar_select %p447_p10, %s2778_s11, 1 }
  0x1d   : > { %s2299_s26 = sshll.u32 %s448_s21, 4  ;;  %s3061_s21 = scalar_lea.vmem [#allocation5], %s2250_s23 }
  0x1e   : > { %s451_s29 = scalar_lea.vmem %s3498_s0, %s2299_s26  ;;  %s2678_s26 = smov 112  }
  0x1f   : > { %v2827_v7 = vld [vmem:[%s451_s29] sm:$0xff]  ;;  %v2829_v8 = vld [vmem:[%s451_s29 + $0x8] sm:$0xff]  ;;  %s3491_s29 = smov 16   ;;  %s3500_s23 = smov 15  }
  0x20   : > { %v493_v10 = vpack.c.bf16 %v2829_v8, %v2827_v7 }
  0x22   : > { %2346 = vmatpush3.bf16.msra.mxu0 %v493_v10 }
  0x23   : > { %2375 = vmatprep.subr.bf16.mxu0 %v2666_v1 }
  0x25   : > { %2348 = vmatmul.mubr.msk.bf16.vlgmr.msra.gmra.mrb[0].mxu0 %vm539_vm1, %v2521_v9 }
  0x26   : > { %2351 = vmatprep.mubr.msk.bf16.mxu0 %vm2667_vm0, %v2666_v1 }
  0x2d   : > { %2352 = vmatmul.mubr.msk.bf16.gmra.mrb[4].mxu0 %vm539_vm1, %v2522_v11 }
  0x2e   : > { %2355 = vmatprep.mubr.msk.bf16.mxu0 %vm2667_vm0, %v2666_v1 }
  0x35   : > { %2356 = vmatmul.mubr.msk.bf16.gmra.mrb[8].mxu0 %vm539_vm1, %v2523_v12 }
  0x36   : > { %2383 = vmatprep.mubr.msk.bf16.mxu0 %vm2667_vm0, %v2666_v1 }
  0x95   : > { %v507_v17 = vpop.permute.xlu0 %506  ;;  %v517_v20 = vpop.permute.xlu1 %516 }
  0x99   : > { %v512_v21 = vpop.permute.xlu0 %511  ;;  %v522_v28 = vpop.permute.xlu1 %521 }
  0xf8   : > { %v2852_v13 = vpop.f32.mrb[0].mxu0 }
  0xf9   : > { %v2349_v14 = vpop.f32.mrb[1].mxu0 }
  0xfa   : > { %v2854_v15 = vpop.f32.mrb[2].mxu0 }
  0xfb   : > { %v2350_v16 = vpop.f32.mrb[3].mxu0 }
 0x100   : > { %v591_v18 = vpop.f32.mrb[4].mxu0 }
 0x101   : > { %v2353_v19 = vpop.f32.mrb[5].mxu0  ;;  %v592_v23 = vadd.f32 %v591_v18, %v507_v17 }
 0x102   : > { %v594_v22 = vpop.f32.mrb[6].mxu0 }
 0x103   : > { %v595_v24 = vadd.f32 %v594_v22, %v512_v21  ;;  %v2354_v25 = vpop.f32.mrb[7].mxu0 }
 0x105   : > { %v607_v26 = vpack.c.bf16 %v595_v24, %v592_v23 }
 0x107   : > { %609 = vxpose.xlu0.c.b16.start.end [1/1] (short) (narrow) %v607_v26, 64 }
 0x108   : > { %v599_v27 = vpop.f32.mrb[8].mxu0 }
 0x109   : > { %v600_v29 = vadd.f32 %v599_v27, %v517_v20  ;;  %v2357_v30 = vpop.f32.mrb[9].mxu0 }
 0x10a   : > { %v602_v31 = vpop.f32.mrb[10].mxu0 }
 0x10b   : > { %v603_v32 = vadd.f32 %v602_v31, %v522_v28  ;;  %v2358_v33 = vpop.f32.mrb[11].mxu0 }
 0x10d   : > { %v608_v34 = vpack.c.bf16 %v603_v32, %v600_v29 }
 0x10f   : > { %2359 = vmatprep.subr.bf16.mxu1 %v608_v34  ;;  %v795_v37 = vsel %vm702_vm2, %v608_v34, 0 }
 0x110   : > { %2360 = vmatpush3.bf16.msra.mxu1 %v608_v34 }
 0x111   : > { %2369 = vmatprep.subr.bf16.mxu1 %v2666_v1 }
 0x16d   : > { %v617_v35 = vpop.trf.xlu0 }
 0x16e   : > { %2361 = vmatprep.mubr.msk.bf16.mxu1 %vm539_vm1, %v617_v35 }
 0x171   : > { %v618_v36 = vpop.trf.xlu0 }
 0x172   : > { %2362 = vmatmul.mubr.msk.bf16.vlgmr.msra.gmra.mrb[0].mxu1 %vm539_vm1, %v618_v36 }
 0x173   : > { %2370 = vmatpush3.bf16.xpose.msra.mxu1 %v795_v37 }
 0x175   : > { %v619_v38 = vpop.trf.xlu0 }
 0x176   : > { %2365 = vmatprep.mubr.msk.bf16.mxu1 %vm539_vm1, %v619_v38 }
 0x179   : > { %v620_v39 = vpop.trf.xlu0 }
 0x17a   : > { %2366 = vmatmul.mubr.msk.bf16.gmra.mrb[4].mxu1 %vm539_vm1, %v620_v39 }
 0x17b   : > { %2371 = vmatprep.mubr.msk.bf16.mxu1 %vm2667_vm0, %v2666_v1 }
 0x182   : > { %2372 = vmatmul.mubr.msk.bf16.vlgmr.msra.gmra.mrb[8].mxu1 %vm702_vm2, %v607_v26 }
 0x245   : > { %v2363_v40 = vpop.f32.mrb[0].mxu1 }
 0x246   : > { %v671_v41 = vpop.f32.mrb[1].mxu1  ;;  %v709_v57 = vsel %vm702_vm2, %v2363_v40, -inf }
 0x247   : > { %v2865_v42 = vpop.f32.mrb[2].mxu1  ;;  %v703_v54 = vsel %vm702_vm2, %v671_v41, -inf }
 0x248   : > { %v674_v43 = vpop.f32.mrb[3].mxu1  ;;  %v712_v58 = vsel %vm702_vm2, %v2865_v42, -inf }
 0x249   : > { %v706_v56 = vsel %vm702_vm2, %v674_v43, -inf }
 0x24d   : > { %v2867_v44 = vpop.f32.mrb[4].mxu1 }
 0x24e   : > { %v2869_v45 = vpop.f32.mrb[5].mxu1  ;;  %v721_v63 = vsel %vm702_vm2, %v2867_v44, -inf }
 0x24f   : > { %v2871_v46 = vpop.f32.mrb[6].mxu1  ;;  %v715_v59 = vsel %vm702_vm2, %v2869_v45, -inf }
 0x250   : > { %v2873_v47 = vpop.f32.mrb[7].mxu1  ;;  %v724_v62 = vsel %vm702_vm2, %v2871_v46, -inf }
 0x251   : > { %v718_v55 = vsel %vm702_vm2, %v2873_v47, -inf }
 0x255   : > { %v831_v48 = vpop.f32.mrb[8].mxu1 }
 0x256   : > { %v2373_v49 = vpop.f32.mrb[9].mxu1  ;;  %v838_v50 = vsel %vm539_vm1, %v831_v48, -inf }
 0x257   : > { %839 = vmax.xlane.f32.xlu1 %v838_v50  ;;  %v834_v51 = vpop.f32.mrb[10].mxu1 }
 0x258   : > { %v2374_v52 = vpop.f32.mrb[11].mxu1  ;;  %v841_v53 = vsel %vm539_vm1, %v834_v51, -inf }
 0x259   : > { %842 = vmax.xlane.f32.xlu0 %v841_v53 }
 0x25b   : > { %704 = vmax.xlane.f32.xlu1 %v703_v54 }
 0x25d   : > { %719 = vmax.xlane.f32.xlu0 %v718_v55  ;;  %v476_v55 = vld [vmem:[%s3477_s5 + $0x8] sm:$0xff] }
 0x25f   : > { %707 = vmax.xlane.f32.xlu1 %v706_v56 }
 0x263   : > { %710 = vmax.xlane.f32.xlu1 %v709_v57 }
 0x267   : > { %713 = vmax.xlane.f32.xlu1 %v712_v58 }
 0x26b   : > { %716 = vmax.xlane.f32.xlu1 %v715_v59 }
 0x273   : > { %501 = vperm.xlu0 %2519, %v460_v60  }
 0x27c   : > { %496 = vperm.xlu1 %2520, %v459_v61  }
 0x292   : > { %725 = vmax.xlane.f32.xlu0 %v724_v62 }
 0x2a0   : > { %722 = vmax.xlane.f32.xlu1 %v721_v63 }
 0x2e4   : > { %v840_v0 = vpop.xlane.xlu1 %839 }
 0x2e5   : > { %v844_v2 = vsub.f32 %v831_v48, %v840_v0 }
 0x2e6   : > { %v843_v4 = vpop.xlane.xlu0 %842 }
 0x2e7   : > { %v846_v5 = vmul.f32 1.442695, %v844_v2  ;;  %v845_v6 = vsub.f32 %v834_v51, %v843_v4 }
 0x2e8   : > { %v705_v9 = vpop.xlane.xlu1 %704 }
 0x2e9   : > { %2530 = vpow2.f32 %v846_v5  ;;  %v848_v10 = vmul.f32 1.442695, %v845_v6  ;;  %v727_v11 = vsub.f32 %v671_v41, %v705_v9 }
 0x2ea   : > { %v720_v26 = vpop.xlane.xlu0 %719 }
 0x2eb   : > { %2532 = vpow2.f32 %v848_v10  ;;  %v735_v12 = vmul.f32 1.442695, %v727_v11  ;;  %v732_v31 = vsub.f32 %v2873_v47, %v720_v26 }
 0x2ec   : > { %v708_v14 = vpop.xlane.xlu1 %707 }
 0x2ed   : > { %2534 = vpow2.f32 %v735_v12  ;;  %v728_v16 = vsub.f32 %v674_v43, %v708_v14  ;;  %v745_v38 = vmul.f32 1.442695, %v732_v31 }
 0x2ef   : > { %v737_v17 = vmul.f32 1.442695, %v728_v16 }
 0x2f0   : > { %v711_v18 = vpop.xlane.xlu1 %710 }
 0x2f1   : > { %2536 = vpow2.f32 %v737_v17  ;;  %v729_v19 = vsub.f32 %v2363_v40, %v711_v18 }
 0x2f2   : > { %v502_v33 = vpop.permute.xlu0 %501 }
 0x2f3   : > { %v2896_v20 = vpop.eup %2530  ;;  %v739_v21 = vmul.f32 1.442695, %v729_v19  ;;  %v587_v39 = vadd.f32 %v2854_v15, %v502_v33 }
 0x2f4   : > { %v714_v22 = vpop.xlane.xlu1 %713  ;;  %v850_v23 = vsel %vm539_vm1, %v2896_v20, 0.0 }
 0x2f5   : > { %v2900_v24 = vpop.eup %2532  ;;  %2538 = vpow2.f32 %v739_v21  ;;  %v730_v25 = vsub.f32 %v2865_v42, %v714_v22  ;;  %851 = vadd.xlane.f32.xlu1 %v850_v23 }
 0x2f6   : > { %v853_v27 = vsel %vm539_vm1, %v2900_v24, 0.0 }
 0x2f7   : > { %v2905_v28 = vpop.eup %2534  ;;  %v741_v29 = vmul.f32 1.442695, %v730_v25  ;;  %854 = vadd.xlane.f32.xlu0 %v853_v27 }
 0x2f8   : > { %v717_v30 = vpop.xlane.xlu1 %716  ;;  %v751_v34 = vsel %vm702_vm2, %v2905_v28, 0.0 }
 0x2f9   : > { %2540 = vpow2.f32 %v741_v29  ;;  %v731_v32 = vsub.f32 %v2869_v45, %v717_v30 }
 0x2fb   : > { %v2911_v35 = vpop.eup %2536  ;;  %v743_v36 = vmul.f32 1.442695, %v731_v32  ;;  %752 = vadd.xlane.f32.xlu0 %v751_v34 }
 0x2fc   : > { %v497_v37 = vpop.permute.xlu1 %496  ;;  %v754_v41 = vsel %vm702_vm2, %v2911_v35, 0.0 }
 0x2fd   : > { %2542 = vpow2.f32 %v743_v36  ;;  %v584_v40 = vadd.f32 %v2852_v13, %v497_v37 }
 0x2fe   : > { %2544 = vpow2.f32 %v745_v38 }
 0x2ff   : > { %v2917_v42 = vpop.eup %2538  ;;  %v2919_v43 = vpack.c.bf16 %v587_v39, %v584_v40  ;;  %755 = vadd.xlane.f32.xlu0 %v754_v41 }
 0x300   : > { %v757_v45 = vsel %vm702_vm2, %v2917_v42, 0.0 }
 0x303   : > { %v2923_v47 = vpop.eup %2540  ;;  %758 = vadd.xlane.f32.xlu0 %v757_v45 }
 0x304   : > { %v760_v15 = vsel %vm702_vm2, %v2923_v47, 0.0 }
 0x307   : > { %v2927_v48 = vpop.eup %2542  ;;  %761 = vadd.xlane.f32.xlu0 %v760_v15 }
 0x308   : > { %v763_v13 = vsel %vm702_vm2, %v2927_v48, 0.0  ;;  %v2931_v49 = vpop.eup %2544 }
 0x309   : > { %v766_v50 = vsel %vm702_vm2, %v2931_v49, 0.0 }
 0x30b   : > { %764 = vadd.xlane.f32.xlu0 %v763_v13 }
 0x30f   : > { %767 = vadd.xlane.f32.xlu0 %v766_v50 }
 0x31f   : > { %v726_v51 = vpop.xlane.xlu0 %725 }
 0x320   : > { %v734_v52 = vsub.f32 %v2871_v46, %v726_v51  ;;  %v475_v46 = vld [vmem:[%s3477_s5] sm:$0xff] }
 0x322   : > { %921 = vxpose.xlu1.c.b16.start.end [1/1] (short) (narrow) %v2919_v43, 64  ;;  %v749_v56 = vmul.f32 1.442695, %v734_v52 }
 0x32d   : > { %v723_v53 = vpop.xlane.xlu1 %722 }
 0x32e   : > { %v733_v54 = vsub.f32 %v2867_v44, %v723_v53 }
 0x330   : > { %v747_v57 = vmul.f32 1.442695, %v733_v54 }
 0x332   : > { %2546 = vpow2.f32 %v747_v57  ;;  %1204 = vperm.xlu1 %2520, %v476_v55  }
 0x333   : > { %2548 = vpow2.f32 %v749_v56 }
 0x33c   : > { %v2941_v58 = vpop.eup %2546 }
 0x33d   : > { %v769_v59 = vsel %vm702_vm2, %v2941_v58, 0.0  ;;  %v2945_v60 = vpop.eup %2548 }
 0x33e   : > { %770 = vadd.xlane.f32.xlu0 %v769_v59  ;;  %v772_v44 = vsel %vm702_vm2, %v2945_v60, 0.0  ;;  %v2525_v59 = vld [vmem:[%s3476_s4 + $0x8] sm:$0xff]  }
 0x342   : > { %773 = vadd.xlane.f32.xlu0 %v772_v44  ;;  %v2527_v44 = vld [vmem:[%s3476_s4 + $0x18] sm:$0xff]  }
 0x358   : > { %1199 = vperm.xlu0 %2519, %v475_v46  }
 0x382   : > { %v852_v61 = vpop.xlane.xlu1 %851 }
 0x383   : > { %2550 = vrcp.f32 %v852_v61 }
 0x384   : > { %v855_v62 = vpop.xlane.xlu0 %854 }
 0x385   : > { %2552 = vrcp.f32 %v855_v62 }
 0x388   : > { %v753_v63 = vpop.xlane.xlu0 %752  ;;  %v929_v0 = vpop.trf.xlu1 }
 0x389   : > { %2389 = vmatprep.mubr.msk.bf16.mxu1 %vm539_vm1, %v929_v0  ;;  %2554 = vrcp.f32 %v753_v63 }
 0x38c   : > { %v756_v2 = vpop.xlane.xlu0 %755  ;;  %v930_v11 = vpop.trf.xlu1 }
 0x38d   : > { %v2551_v4 = vpop.eup %2550  ;;  %2556 = vrcp.f32 %v756_v2  ;;  %v2528_v2 = vld [vmem:[%s3475_s3] sm:$0xff]  }
 0x38e   : > { %v858_v9 = vmul.f32 %v2551_v4, %v2896_v20 }
 0x38f   : > { %v2553_v5 = vpop.eup %2552 }
 0x390   : > { %v759_v6 = vpop.xlane.xlu0 %758  ;;  %v859_v10 = vmul.f32 %v2553_v5, %v2900_v24  ;;  %v931_v17 = vpop.trf.xlu1 }
 0x391   : > { %2558 = vrcp.f32 %v759_v6 }
 0x392   : > { %v920_v12 = vpack.c.bf16 %v859_v10, %v858_v9  ;;  %v2670_v10 = vmov 0.0|0.0  }
 0x393   : > { %v2555_v16 = vpop.eup %2554 }
 0x394   : > { %2387 = vmatprep.subr.bf16.mxu1 %v920_v12  ;;  %v762_v14 = vpop.xlane.xlu0 %761  ;;  %v783_v21 = vmul.f32 %v2555_v16, %v2905_v28  ;;  %v932_v26 = vpop.trf.xlu1 }
 0x395   : > { %2560 = vrcp.f32 %v762_v14  ;;  %2388 = vmatpush3.bf16.msra.mxu1 %v920_v12 }
 0x397   : > { %v2557_v18 = vpop.eup %2556 }
 0x398   : > { %2390 = vmatmul.mubr.msk.bf16.vlgmr.msra.gmra.mrb[12].mxu1 %vm539_vm1, %v930_v11  ;;  %v765_v19 = vpop.xlane.xlu0 %764  ;;  %v784_v22 = vmul.f32 %v2557_v18, %v2911_v35 }
 0x399   : > { %2393 = vmatprep.mubr.msk.bf16.mxu1 %vm539_vm1, %v931_v17  ;;  %2562 = vrcp.f32 %v765_v19 }
 0x39a   : > { %v860_v20 = vpack.c.bf16 %v784_v22, %v783_v21 }
 0x39b   : > { %v2559_v25 = vpop.eup %2558 }
 0x39c   : > { %v768_v23 = vpop.xlane.xlu0 %767  ;;  %v868_v24 = vsel %vm702_vm2, %v860_v20, 0  ;;  %v785_v28 = vmul.f32 %v2559_v25, %v2917_v42 }
 0x39d   : > { %2564 = vrcp.f32 %v768_v23  ;;  %2376 = vmatpush3.bf16.xpose.msra.mxu0 %v868_v24 }
 0x39e   : > { %2377 = vmatprep.subr.bf16.mxu0 %v2666_v1 }
 0x39f   : > { %v2561_v27 = vpop.eup %2560 }
 0x3a0   : > { %2394 = vmatmul.mubr.msk.bf16.gmra.mrb[16].mxu1 %vm539_vm1, %v932_v26  ;;  %v786_v29 = vmul.f32 %v2561_v27, %v2923_v47 }
 0x3a2   : > { %v861_v30 = vpack.c.bf16 %v786_v29, %v785_v28 }
 0x3a3   : > { %v2563_v32 = vpop.eup %2562 }
 0x3a4   : > { %v871_v31 = vsel %vm702_vm2, %v861_v30, 0  ;;  %v787_v34 = vmul.f32 %v2563_v32, %v2927_v48  ;;  %v2524_v48 = vld [vmem:[%s3476_s4] sm:$0xff]  }
 0x3a5   : > { %2378 = vmatpush3.bf16.xpose.msra.mxu0 %v871_v31  ;;  %2411 = vmatprep.mubr.msk.bf16.mxu1 %vm702_vm2, %v2524_v48 }
 0x3a6   : > { %2379 = vmatprep.subr.bf16.mxu0 %v2666_v1 }
 0x3a7   : > { %v2565_v33 = vpop.eup %2564 }
 0x3a8   : > { %v788_v35 = vmul.f32 %v2565_v33, %v2931_v49 }
 0x3aa   : > { %v862_v36 = vpack.c.bf16 %v788_v35, %v787_v34 }
 0x3ac   : > { %v874_v37 = vsel %vm702_vm2, %v862_v36, 0 }
 0x3ad   : > { %2380 = vmatpush3.bf16.xpose.msra.mxu0 %v874_v37 }
 0x3ae   : > { %2381 = vmatprep.subr.bf16.mxu0 %v2666_v1 }
 0x3b1   : > { %v1205_v23 = vpop.permute.xlu1 %1204 }
 0x3b2   : > { %v1208_v29 = vadd.f32 %v1205_v23, %v2829_v8  ;;  %v478_v8 = vld [vmem:[%s3478_s6 + $0x4] sm:$0xf] }
 0x3cb   : > { %v771_v38 = vpop.xlane.xlu0 %770 }
 0x3cc   : > { %2566 = vrcp.f32 %v771_v38 }
 0x3cf   : > { %v774_v39 = vpop.xlane.xlu0 %773 }
 0x3d0   : > { %2568 = vrcp.f32 %v774_v39 }
 0x3d6   : > { %v2567_v40 = vpop.eup %2566 }
 0x3d7   : > { %v789_v42 = vmul.f32 %v2567_v40, %v2941_v58  ;;  %v1200_v22 = vpop.permute.xlu0 %1199 }
 0x3d8   : > { %v1207_v26 = vadd.f32 %v1200_v22, %v2827_v7  ;;  %v477_v7 = vld [vmem:[%s3478_s6] sm:$0xf] }
 0x3da   : > { %v2569_v41 = vpop.eup %2568 }
 0x3db   : > { %v790_v45 = vmul.f32 %v2569_v41, %v2945_v60  ;;  %v2526_v60 = vld [vmem:[%s3476_s4 + $0x10] sm:$0xff]  }
 0x3dd   : > { %v863_v47 = vpack.c.bf16 %v790_v45, %v789_v42  ;;  %v479_v42 = vld [vmem:[%s3478_s6 + $0x8] sm:$0xf]  ;;  %v480_v45 = vld [vmem:[%s3478_s6 + $0xc] sm:$0xf] }
 0x3df   : > { %v877_v15 = vsel %vm702_vm2, %v863_v47, 0 }
 0x3e0   : > { %2382 = vmatpush3.bf16.xpose.msra.mxu0 %v877_v15 }
 0x3e1   : > { %2397 = vmatprep.subr.bf16.mxu0 %v2666_v1 }
 0x3e7   : > { %2384 = vmatmul.mubr.msk.bf16.vlgmr.msra.gmra.mrb[12].mxu0 %vm702_vm2, %v2919_v43 }
 0x3e8   : > { %2399 = vmatprep.mubr.msk.bf16.mxu0 %vm2667_vm0, %v2666_v1 }
 0x46b   : > { %v2391_v13 = vpop.f32.mrb[12].mxu1 }
 0x46c   : > { %v983_v49 = vpop.f32.mrb[13].mxu1 }
 0x46d   : > { %v2392_v50 = vpop.f32.mrb[14].mxu1 }
 0x46e   : > { %v1065_v51 = vpack.c.bf16 %v2392_v50, %v2391_v13  ;;  %v986_v52 = vpop.f32.mrb[15].mxu1 }
 0x46f   : > { %v1064_v53 = vpack.c.bf16 %v986_v52, %v983_v49  ;;  %v1524_v52 = vlaneseq }
 0x471   : > { %2403 = vmatprep.subr.bf16.mxu1 %v1064_v53 }
 0x472   : > { %2404 = vmatpush3.bf16.msra.mxu1 %v1064_v53  ;;  %v3030_v53 = vshrl.u32 %v1524_v52, 7 }
 0x473   : > { %v2395_v54 = vpop.f32.mrb[16].mxu1  ;;  %2405 = vmatprep.subr.bf16.mxu1 %v1065_v51 }
 0x474   : > { %v999_v43 = vpop.f32.mrb[17].mxu1  ;;  %v3108_v22 = vsub.s32 0, %v3030_v53 }
 0x475   : > { %v2396_v55 = vpop.f32.mrb[18].mxu1 }
 0x476   : > { %v1067_v56 = vpack.c.bf16 %v2396_v55, %v2395_v54  ;;  %v1002_v57 = vpop.f32.mrb[19].mxu1  ;;  %2406 = vmatpush3.bf16.msra.mxu1 %v1065_v51  ;;  %v1612_v54 = vsub.s32 4, %v3030_v53 }
 0x477   : > { %v1066_v58 = vpack.c.bf16 %v1002_v57, %v999_v43 }
 0x479   : > { %2407 = vmatprep.subr.bf16.mxu1 %v1066_v58 }
 0x47a   : > { %2408 = vmatpush3.bf16.msra.mxu1 %v1066_v58  ;;  %v3047_v58 = vld [vmem:[%s3479_s7 + $0x8] sm:$0xff] }
 0x47b   : > { %2409 = vmatprep.subr.bf16.mxu1 %v1067_v56 }
 0x47e   : > { %2410 = vmatpush3.bf16.msra.mxu1 %v1067_v56 }
 0x481   : > { %2412 = vmatmul.mubr.msk.bf16.vlgmr.msra.gmra.mrb[20].mxu1 %vm702_vm2, %v2525_v59  ;;  %v3054_v59 = vrot.slane %v3047_v58, %v1612_v54 }
 0x482   : > { %2415 = vmatprep.mubr.msk.bf16.mxu1 %vm702_vm2, %v2526_v60 }
 0x489   : > { %2416 = vmatmul.mubr.msk.bf16.gmra.mrb[24].mxu1 %vm702_vm2, %v2527_v44 }
 0x4ba   : > { %v913_v46 = vpop.f32.mrb[12].mxu0 }
 0x4bb   : > { %v2385_v61 = vpop.f32.mrb[13].mxu0 }
 0x4bc   : > { %v916_v62 = vpop.f32.mrb[14].mxu0 }
 0x4bd   : > { %v1014_v63 = vpack.c.bf16 %v916_v62, %v913_v46  ;;  %v2386_v0 = vpop.f32.mrb[15].mxu0  ;;  %v487_v62 = vld [vmem:[%s3481_s9] sm:$0xff] }
 0x4bf   : > { %2398 = vmatpush3.bf16.msra.mxu0 %v1014_v63  ;;  %v488_v63 = vld [vmem:[%s3481_s9 + $0x8] sm:$0xff] }
 0x4c0   : > { %2447 = vmatprep.subr.bf16.mxu0 %v2670_v10 }
 0x4c2   : > { %2400 = vmatmul.mubr.msk.bf16.vlgmr.msra.gmra.mrb[16].mxu0 %vm539_vm1, %v2528_v2  ;;  %v3083_v2 = vand.u32 127, %v1524_v52 }
 0x4c3   : > { %2423 = vmatprep.mubr.msk.f32.mxu0 %vm2667_vm0, %v2666_v1 }
 0x4c4   : > { %vm1545_vm5 = vcmp.lt.s32.totalorder %v3083_v2, 16  ;;  %vm1589_vm6 = vcmp.lt.s32.totalorder %v3083_v2, 1  ;;  %vm1526_vm7 = vcmp.lt.s32.totalorder %v3083_v2, 17  ;;  %vm1570_vm8 = vcmp.lt.s32.totalorder %v3083_v2, 15 }
 0x4c5   : > { %vm1626_vm9 = vcmp.lt.s32.totalorder %v3083_v2, 127  ;;  %vm1670_vm10 = vcmp.lt.s32.totalorder %v3083_v2, 112  ;;  %vm1651_vm11 = vcmp.lt.s32.totalorder %v3083_v2, 113  ;;  %vm1695_vm12 = vcmp.lt.s32.totalorder %v3083_v2, 111 }
 0x554   : > { %v2413_v4 = vpop.f32.mrb[20].mxu1 }
 0x555   : > { %1167 = vrot.lane.b32.xlu0 %v2413_v4, %s3491_s29  ;;  %v1134_v5 = vpop.f32.mrb[21].mxu1  ;;  %v1550_v4 = vsub.s32 1, %v3030_v53 }
 0x556   : > { %v2414_v6 = vpop.f32.mrb[22].mxu1 }
 0x557   : > { %v1137_v9 = vpop.f32.mrb[23].mxu1 }
 0x559   : > { %1169 = vrot.lane.b32.xlu0 %v2414_v6, %s3491_s29  ;;  %v1594_v6 = vsub.s32 3, %v3030_v53 }
 0x55c   : > { %v2417_v11 = vpop.f32.mrb[24].mxu1 }
 0x55d   : > { %v1150_v12 = vpop.f32.mrb[25].mxu1 }
 0x55e   : > { %1175 = vrot.lane.b32.xlu1 %v1150_v12, %s2671_s18  ;;  %v2418_v14 = vpop.f32.mrb[26].mxu1 }
 0x55f   : > { %v1153_v16 = vpop.f32.mrb[27].mxu1 }
 0x560   : > { %1177 = vrot.lane.b32.xlu0 %v1153_v16, %s2671_s18  ;;  %s2673_s18 = smov 64  }
 0x562   : > { %1183 = vrot.lane.b32.xlu1 %v2417_v11, %s2672_s25 }
 0x564   : > { %1185 = vrot.lane.b32.xlu0 %v2418_v14, %s2672_s25  ;;  %s2677_s25 = smov 127  }
 0x595   : > { %v1057_v17 = vpop.f32.mrb[16].mxu0 }
 0x596   : > { %v2401_v18 = vpop.f32.mrb[17].mxu0  ;;  %v1209_v30 = vadd.f32 %v1207_v26, %v1057_v17 }
 0x597   : > { %v1060_v19 = vpop.f32.mrb[18].mxu0 }
 0x598   : > { %v2402_v21 = vpop.f32.mrb[19].mxu0  ;;  %v1210_v35 = vadd.f32 %v1208_v29, %v1060_v19 }
 0x599   : > { %v3105_v21 = vrot.slane %v3047_v58, %v1594_v6 }
 0x5c7   : > { %v1168_v20 = vpop.permute.xlu0 %1167 }
 0x5c8   : > { %v1189_v28 = vsel %vm539_vm1, %v1134_v5, %v1168_v20 }
 0x5cb   : > { %v1170_v24 = vpop.permute.xlu0 %1169 }
 0x5cc   : > { %v1190_v33 = vsel %vm539_vm1, %v1137_v9, %v1170_v24 }
 0x5d0   : > { %v1176_v25 = vpop.permute.xlu1 %1175 }
 0x5d1   : > { %v1192_v31 = vsel %vm1191_vm3, %v1189_v28, %v1176_v25  ;;  %v1575_v28 = vsub.s32 2, %v3030_v53 }
 0x5d2   : > { %v1178_v27 = vpop.permute.xlu0 %1177 }
 0x5d3   : > { %v1193_v36 = vsel %vm1191_vm3, %v1190_v33, %v1178_v27 }
 0x5d4   : > { %v1184_v32 = vpop.permute.xlu1 %1183 }
 0x5d5   : > { %v1195_v34 = vsel %vm1194_vm4, %v1192_v31, %v1184_v32  ;;  %v3124_v32 = vrot.slane %v3047_v58, %v3108_v22 }
 0x5d6   : > { %v1211_v37 = vadd.f32 %v1209_v30, %v1195_v34  ;;  %v1186_v38 = vpop.permute.xlu0 %1185 }
 0x5d7   : > { %v1196_v39 = vsel %vm1194_vm4, %v1193_v36, %v1186_v38 }
 0x5d8   : > { %v1212_v40 = vadd.f32 %v1210_v35, %v1196_v39 }
 0x5da   : > { %v2448_v41 = vpack.c.bf16 %v1212_v40, %v1211_v37 }
 0x5dc   : > { %2449 = vmatpush3.bf16.msra.mxu0 %v2448_v41 }
 0x5dd   : > { %2450 = vmatprep.subr.bf16.mxu0 %v2670_v10 }
 0x5df   : > { %2424 = vmatmul.mubr.msk.f32.vlgmr.msra.gmra.mrb[20].mxu0 %vm539_vm1, %v477_v7  ;;  %v3137_v7 = vrot.slane %v3047_v58, %v1575_v28 }
 0x5e0   : > { %2452 = vmatpush3.bf16.msra.mxu0 %v2448_v41  ;;  %2430 = vmatprep.mubr.msk.f32.mxu0 %vm2667_vm0, %v2666_v1 }
 0x5e1   : > { %2453 = vmatprep.subr.bf16.mxu0 %v2670_v10 }
 0x5e3   : > { %2431 = vmatmul.mubr.msk.f32.vlgmr.msra.gmra.mrb[22].mxu0 %vm539_vm1, %v478_v8  ;;  %v1631_v8 = vsub.s32 5, %v3030_v53 }
 0x5e4   : > { %2455 = vmatpush3.bf16.msra.mxu0 %v2448_v41  ;;  %2437 = vmatprep.mubr.msk.f32.mxu0 %vm2667_vm0, %v2666_v1 }
 0x5e5   : > { %2456 = vmatprep.subr.bf16.mxu0 %v2670_v10  ;;  %v3092_v10 = vrot.slane %v3047_v58, %v1550_v4 }
 0x5e7   : > { %2438 = vmatmul.mubr.msk.f32.vlgmr.msra.gmra.mrb[24].mxu0 %vm539_vm1, %v479_v42 }
 0x5e8   : > { %2458 = vmatpush3.bf16.msra.mxu0 %v2448_v41  ;;  %2444 = vmatprep.mubr.msk.f32.mxu0 %vm2667_vm0, %v2666_v1 }
 0x5eb   : > { %2445 = vmatmul.mubr.msk.f32.vlgmr.msra.gmra.mrb[26].mxu0 %vm539_vm1, %v480_v45 }
 0x5ec   : > { %1784 = vmatprep.mubr.bf16.mxu0 %v2668_v3  ;;  %v3036_v3 = vld [vmem:[%s3479_s7] sm:$0xff] }
 0x5ed   : > { %v3039_v43 = vrot.slane %v3036_v3, %v1612_v54  ;;  %v3089_v9 = vrot.slane %v3036_v3, %v1550_v4  ;;  %v3100_v17 = vrot.slane %v3036_v3, %v1594_v6  ;;  %v3120_v31 = vrot.slane %v3036_v3, %v3108_v22 }
 0x5ee   : > { %v3132_v38 = vrot.slane %v3036_v3, %v1575_v28 }
 0x6b2   : > { %v1282_v47 = vpop.f32.mrb[20].mxu0 }
 0x6b3   : > { %v2425_v15 = vpop.f32.mrb[21].mxu0 }
 0x6b4   : > { %v1675_v15 = vsub.s32 7, %v3030_v53 }
 0x6b6   : > { %v1355_v48 = vpop.f32.mrb[22].mxu0 }
 0x6b7   : > { %1506 = vrot.lane.b32.xlu1 %v1355_v48, %s2673_s18  ;;  %v2432_v13 = vpop.f32.mrb[23].mxu0 }
 0x6ba   : > { %v1428_v49 = vpop.f32.mrb[24].mxu0 }
 0x6bb   : > { %v2439_v50 = vpop.f32.mrb[25].mxu0 }
 0x6bc   : > { %v3152_v50 = vrot.slane %v3047_v58, %v1631_v8 }
 0x6be   : > { %v1501_v51 = vpop.f32.mrb[26].mxu0 }
 0x6bf   : > { %1510 = vrot.lane.b32.xlu0 %v1501_v51, %s2673_s18  ;;  %v2446_v1 = vpop.f32.mrb[27].mxu0  ;;  %s3489_s18 = smov 15  }
 0x729   : > { %v1507_v55 = vpop.permute.xlu1 %1506 }
 0x72a   : > { %v1513_v56 = vsel %vm702_vm2, %v1282_v47, %v1507_v55 }
 0x72b   : > { %1541 = vrot.lane.b32.xlu1 %v1513_v56, %s3491_s29  ;;  %v1618_v57 = vmul.f32 %v3039_v43, %v1513_v56 }
 0x72d   : > { %1620 = vst [vmem:[#allocation2 + $0x20] sm:$0xf] %v1618_v57 }
 0x72f   : > { %1585 = vrot.lane.b32.xlu1 %v1513_v56, %s3487_s22 }
 0x731   : > { %v1511_v60 = vpop.permute.xlu0 %1510 }
 0x732   : > { %v1514_v44 = vsel %vm702_vm2, %v1428_v49, %v1511_v60  ;;  %v3149_v49 = vrot.slane %v3036_v3, %v1631_v8 }
 0x733   : > { %1520 = vrot.lane.b32.xlu1 %v1513_v56, %s2675_s24  ;;  %1543 = vrot.lane.b32.xlu0 %v1514_v44, %s3491_s29  ;;  %v1619_v46 = vmul.f32 %v3054_v59, %v1514_v44  ;;  %v1517_v61 = vcombine.low %v1513_v56, %v1514_v44  ;;  %s3501_s29 = smov 1  }
 0x735   : > { %1621 = vst [vmem:[#allocation2 + $0x28] sm:$0xf] %v1619_v46  ;;  %1519 = vst [vmem:[%s3061_s21] sm:$0xff] %v1517_v61  ;;  %v1656_v46 = vsub.s32 6, %v3030_v53 }
 0x737   : > { %1566 = vrot.lane.b32.xlu1 %v1513_v56, %s3489_s18  ;;  %1587 = vrot.lane.b32.xlu0 %v1514_v44, %s3487_s22 }
 0x73b   : > { %1622 = vrot.lane.b32.xlu1 %v1513_v56, %s2677_s25  ;;  %1522 = vrot.lane.b32.xlu0 %v1514_v44, %s2675_s24 }
 0x73f   : > { %1666 = vrot.lane.b32.xlu1 %v1513_v56, %s2678_s26  ;;  %1568 = vrot.lane.b32.xlu0 %v1514_v44, %s3489_s18  ;;  %s3499_s18 = smov 16  }
 0x743   : > { %1647 = vrot.lane.b32.xlu1 %v1513_v56, %s2679_s14  ;;  %1624 = vrot.lane.b32.xlu0 %v1514_v44, %s2677_s25 }
 0x747   : > { %1691 = vrot.lane.b32.xlu1 %v1513_v56, %s2680_s16  ;;  %1668 = vrot.lane.b32.xlu0 %v1514_v44, %s2678_s26  ;;  %v3160_v56 = vrot.slane %v3036_v3, %v1675_v15 }
 0x74b   : > { %1728 = vperm.xlu1 %2520, %v487_v62   ;;  %1649 = vrot.lane.b32.xlu0 %v1514_v44, %s2679_s14 }
 0x74f   : > { %1693 = vrot.lane.b32.xlu0 %v1514_v44, %s2680_s16  ;;  %v3165_v44 = vrot.slane %v3047_v58, %v1675_v15 }
 0x753   : > { %1733 = vperm.xlu0 %2519, %v488_v63  }
 0x79d   : > { %v1542_v0 = vpop.permute.xlu1 %1541 }
 0x7a1   : > { %v1586_v5 = vpop.permute.xlu1 %1585 }
 0x7a5   : > { %v1521_v11 = vpop.permute.xlu1 %1520  ;;  %v1544_v12 = vpop.permute.xlu0 %1543 }
 0x7a6   : > { %v1546_v14 = vsel %vm1545_vm5, %v1542_v0, %v1544_v12  ;;  %v1547_v16 = vsel %vm1545_vm5, %v1544_v12, %v1542_v0  ;;  %v3176_v12 = vrot.slane %v3036_v3, %v1656_v46 }
 0x7a7   : > { %v1556_v18 = vmul.f32 %v3089_v9, %v1547_v16  ;;  %v1557_v19 = vmul.f32 %v3092_v10, %v1546_v14  ;;  %v3179_v14 = vrot.slane %v3047_v58, %v1656_v46 }
 0x7a9   : > { %v1560_v20 = vrot.slane %v1556_v18, 4  ;;  %v1561_v23 = vrot.slane %v1557_v19, 4  ;;  %v1567_v24 = vpop.permute.xlu1 %1566  ;;  %v1588_v25 = vpop.permute.xlu0 %1587 }
 0x7aa   : > { %v1590_v26 = vsel %vm1589_vm6, %v1586_v5, %v1588_v25  ;;  %v1591_v27 = vsel %vm1589_vm6, %v1588_v25, %v1586_v5 }
 0x7ab   : > { %1564 = vst [vmem:[#allocation2] sm:$0xf0] %v1560_v20  ;;  %1565 = vst [vmem:[#allocation2 + $0x8] sm:$0xf0] %v1561_v23  ;;  %v1600_v29 = vmul.f32 %v3100_v17, %v1591_v27  ;;  %v1601_v30 = vmul.f32 %v3105_v21, %v1590_v26 }
 0x7ad   : > { %v1604_v33 = vrot.slane %v1600_v29, 4  ;;  %v1605_v34 = vrot.slane %v1601_v30, 4  ;;  %v1523_v35 = vpop.permute.xlu0 %1522  ;;  %v1623_v39 = vpop.permute.xlu1 %1622  ;;  %v3191_v30 = vld [vmem:[%s3479_s7 + $0x10] ss:$0 sm:$0xff] }
 0x7ae   : > { %v1527_v36 = vsel %vm1526_vm7, %v1521_v11, %v1523_v35  ;;  %v1528_v37 = vsel %vm1526_vm7, %v1523_v35, %v1521_v11 }
 0x7af   : > { %1608 = vst [vmem:[#allocation2 + $0x10] sm:$0xf0] %v1604_v33  ;;  %1609 = vst [vmem:[#allocation2 + $0x18] sm:$0xf0] %v1605_v34  ;;  %v1537_v40 = vmul.f32 %v3120_v31, %v1528_v37  ;;  %v1538_v41 = vmul.f32 %v3124_v32, %v1527_v36  ;;  %v3196_v33 = vld [vmem:[%s3479_s7 + $0x18] ss:$0 sm:$0xff] }
 0x7b1   : > { %1539 = vst [vmem:[#allocation2] sm:$0xf] %v1537_v40  ;;  %1540 = vst [vmem:[#allocation2 + $0x8] sm:$0xf] %v1538_v41  ;;  %v1569_v42 = vpop.permute.xlu0 %1568  ;;  %v1667_v51 = vpop.permute.xlu1 %1666 }
 0x7b2   : > { %v1571_v45 = vsel %vm1570_vm8, %v1567_v24, %v1569_v42  ;;  %v1572_v47 = vsel %vm1570_vm8, %v1569_v42, %v1567_v24 }
 0x7b3   : > { %v1581_v48 = vmul.f32 %v3132_v38, %v1572_v47  ;;  %v1582_v13 = vmul.f32 %v3137_v7, %v1571_v45 }
 0x7b5   : > { %1583 = vst [vmem:[#allocation2 + $0x10] sm:$0xf] %v1581_v48  ;;  %1584 = vst [vmem:[#allocation2 + $0x18] sm:$0xf] %v1582_v13  ;;  %v1625_v1 = vpop.permute.xlu0 %1624  ;;  %v1648_v5 = vpop.permute.xlu1 %1647 }
 0x7b6   : > { %v1627_v54 = vsel %vm1626_vm9, %v1623_v39, %v1625_v1  ;;  %v1628_v55 = vsel %vm1626_vm9, %v1625_v1, %v1623_v39 }
 0x7b7   : > { %v1637_v57 = vmul.f32 %v3149_v49, %v1627_v54  ;;  %v1638_v60 = vmul.f32 %v3152_v50, %v1628_v55  ;;  %v2529_v55 = vld [vmem:[%s3480_s8] sm:$0xff]  }
 0x7b8   : > { %v1711_v16 = vld [vmem:[#allocation2 + $0x8] sm:$0xff]  ;;  %v1710_v19 = vld [vmem:[#allocation2] sm:$0xff] }
 0x7b9   : > { %v1641_v61 = vrot.slane %v1637_v57, 4  ;;  %v1642_v62 = vrot.slane %v1638_v60, 4  ;;  %v1669_v63 = vpop.permute.xlu0 %1668  ;;  %v1692_v34 = vpop.permute.xlu1 %1691 }
 0x7ba   : > { %v1671_v0 = vsel %vm1670_vm10, %v1667_v51, %v1669_v63  ;;  %v1672_v4 = vsel %vm1670_vm10, %v1669_v63, %v1667_v51 }
 0x7bb   : > { %1645 = vst [vmem:[#allocation2 + $0x20] sm:$0xf0] %v1641_v61  ;;  %1646 = vst [vmem:[#allocation2 + $0x28] sm:$0xf0] %v1642_v62  ;;  %v1681_v6 = vmul.f32 %v3160_v56, %v1671_v0  ;;  %v1682_v11 = vmul.f32 %v3165_v44, %v1672_v4 }
 0x7bc   : > { %v1713_v18 = vld [vmem:[#allocation2 + $0x18] sm:$0xff]  ;;  %v1712_v20 = vld [vmem:[#allocation2 + $0x10] sm:$0xff] }
 0x7bd   : > { %v1685_v23 = vrot.slane %v1681_v6, 4  ;;  %v1686_v24 = vrot.slane %v1682_v11, 4  ;;  %v1650_v25 = vpop.permute.xlu0 %1649  ;;  %v1721_v26 = vpack.c.bf16 %v1713_v18, %v1711_v16  ;;  %v1720_v27 = vpack.c.bf16 %v1712_v20, %v1710_v19 }
 0x7be   : > { %v1652_v28 = vsel %vm1651_vm11, %v1648_v5, %v1650_v25  ;;  %v1653_v29 = vsel %vm1651_vm11, %v1650_v25, %v1648_v5 }
 0x7bf   : > { %1689 = vst [vmem:[#allocation2 + $0x30] sm:$0xf0] %v1685_v23  ;;  %1690 = vst [vmem:[#allocation2 + $0x38] sm:$0xf0] %v1686_v24  ;;  %v1662_v3 = vmul.f32 %v3176_v12, %v1652_v28  ;;  %v1663_v58 = vmul.f32 %v3179_v14, %v1653_v29  ;;  %1752 = vmatprep.subr.bf16.mxu0 %v1721_v26 }
 0x7c0   : > { %1753 = vmatpush1.bf16.msra.mxu0 %v1720_v27  ;;  %v3253_v29 = vld.sshfl [vmem:[%s3482_s10] sm:$0x11 pattern:$0x75316420] }
 0x7c1   : > { %1664 = vst [vmem:[#allocation2 + $0x30] sm:$0xf] %v1662_v3  ;;  %1665 = vst [vmem:[#allocation2 + $0x38] sm:$0xf] %v1663_v58  ;;  %v1694_v35 = vpop.permute.xlu0 %1693  ;;  %v2038_v3 = vcombine.high %v3253_v29, %v3253_v29 }
 0x7c2   : > { %v1696_v36 = vsel %vm1695_vm12, %v1692_v34, %v1694_v35  ;;  %v1697_v37 = vsel %vm1695_vm12, %v1694_v35, %v1692_v34  ;;  %v1715_v41 = vld [vmem:[#allocation2 + $0x28] sm:$0xff]  ;;  %v1714_v42 = vld [vmem:[#allocation2 + $0x20] sm:$0xff]  ;;  %v490_v35 = vld [vmem:[#allocation4] sm:$0x1] }
 0x7c3   : > { %v1706_v39 = vmul.f32 %v3191_v30, %v1696_v36  ;;  %v1707_v40 = vmul.f32 %v3196_v33, %v1697_v37 }
 0x7c5   : > { %1708 = vst [vmem:[#allocation2 + $0x40] sm:$0xf] %v1706_v39  ;;  %1709 = vst [vmem:[#allocation2 + $0x48] sm:$0xf] %v1707_v40 }
 0x7c8   : > { %v1717_v8 = vld [vmem:[#allocation2 + $0x38] sm:$0xff]  ;;  %v1716_v45 = vld [vmem:[#allocation2 + $0x30] sm:$0xff] }
 0x7c9   : > { %v1723_v47 = vpack.c.bf16 %v1717_v8, %v1715_v41  ;;  %v1722_v15 = vpack.c.bf16 %v1716_v45, %v1714_v42 }
 0x7ca   : > { %v1729_v57 = vpop.permute.xlu1 %1728 }
 0x7cb   : > { %1754 = vmatprep.subr.bf16.mxu0 %v1723_v47 }
 0x7cc   : > { %1755 = vmatpush1.bf16.msra.mxu0 %v1722_v15  ;;  %v1719_v48 = vld [vmem:[#allocation2 + $0x48] sm:$0xf]  ;;  %v1718_v13 = vld [vmem:[#allocation2 + $0x40] sm:$0xf] }
 0x7cd   : > { %v1725_v51 = vpack.c.bf16 %v1719_v48, %v1719_v48  ;;  %v1724_v1 = vpack.c.bf16 %v1718_v13, %v1718_v13 }
 0x7cf   : > { %2287 = vmatprep.subr.msk.bf16.mxu0 %vm1745_vm13, %v1725_v51  ;;  %v1747_v54 = vsel %vm1745_vm13, %v1724_v1, 0 }
 0x7d0   : > { %1757 = vmatpush1.bf16.msra.mxu0 %v1747_v54 }
 0x7d2   : > { %v1734_v62 = vpop.permute.xlu0 %1733 }
 0x7d3   : > { %2288 = vmatmul.mubr.msk.bf16.vlgmr.msra.gmra.mrb[28].mxu0 %vm1741_vm14, %v2529_v55 }
 0x8a6   : > { %v1786_v60 = vpop.f32.mrb[28].mxu0 }
 0x8a7   : > { %v1787_v46 = vadd.f32 %v1786_v60, %v1729_v57  ;;  %v1788_v61 = vpop.f32.mrb[29].mxu0 }
 0x8a8   : > { %v1789_v63 = vadd.f32 %v1788_v61, %v1729_v57  ;;  %v1790_v0 = vpop.f32.mrb[30].mxu0 }
 0x8a9   : > { %v1795_v4 = vmax.f32 %v1787_v46, 0.0  ;;  %v1791_v5 = vadd.f32 %v1790_v0, %v1734_v62  ;;  %v1792_v6 = vpop.f32.mrb[31].mxu0 }
 0x8aa   : > { %v1796_v11 = vmax.f32 %v1789_v63, 0.0  ;;  %v1793_v16 = vadd.f32 %v1792_v6, %v1734_v62 }
 0x8ab   : > { %v1797_v18 = vmax.f32 %v1791_v5, 0.0  ;;  %1799 = vrot.lane.b32.xlu1 %v1795_v4, %s2675_s24  ;;  %v3210_v20 = vmul.f32 %v1795_v4, %v3039_v43 }
 0x8ac   : > { %v1798_v19 = vmax.f32 %v1793_v16, 0.0  ;;  %v3216_v24 = vmul.f32 %v1796_v11, %v3054_v59 }
 0x8ad   : > { %1801 = vrot.lane.b32.xlu0 %v1797_v18, %s2675_s24  ;;  %v3213_v23 = vmul.f32 %v1797_v18, %v3039_v43  ;;  %v2681_v43 = vmov 1966171168  }
 0x8ae   : > { %v3219_v25 = vmul.f32 %v1798_v19, %v3054_v59  ;;  %v2040_v59 = vunpack.c.l.s4 %v2681_v43 }
 0x8af   : > { %1819 = vrot.lane.b32.xlu1 %v1795_v4, %s3499_s18  ;;  %v2011_v26 = vpack.c.bf16 %v3213_v23, %v3210_v20 }
 0x8b0   : > { %v2012_v27 = vpack.c.bf16 %v3219_v25, %v3216_v24  ;;  %v2041_v28 = vunpack.c.0.s8 %v2040_v59 }
 0x8b1   : > { %1821 = vrot.lane.b32.xlu0 %v1797_v18, %s3499_s18 }
 0x8b2   : > { %v3259_v58 = vsub.s32 %v2041_v28, %v3030_v53 }
 0x8b3   : > { %1839 = vrot.lane.b32.xlu1 %v1795_v4, %s3500_s23 }
 0x8b4   : > { %v2052_v34 = vrot.slane %v2038_v3, %v3259_v58  ;;  %v2045_v2 = vrot.slane %v3253_v29, %v3259_v58 }
 0x8b5   : > { %1841 = vrot.lane.b32.xlu0 %v1797_v18, %s3500_s23 }
 0x8b6   : > { %2290 = vmatprep.mubr.msk.bf16.mxu1 %vm539_vm1, %v2052_v34 }
 0x8b7   : > { %1859 = vrot.lane.b32.xlu1 %v1795_v4, %s3501_s29 }
 0x8b9   : > { %1861 = vrot.lane.b32.xlu0 %v1797_v18, %s3501_s29 }
 0x8bb   : > { %1887 = vrot.lane.b32.xlu1 %v1795_v4, %s2677_s25 }
 0x8bd   : > { %1889 = vrot.lane.b32.xlu0 %v1797_v18, %s2677_s25 }
 0x8bf   : > { %1907 = vrot.lane.b32.xlu1 %v1795_v4, %s2679_s14 }
 0x8c1   : > { %1909 = vrot.lane.b32.xlu0 %v1797_v18, %s2679_s14 }
 0x8c3   : > { %1927 = vrot.lane.b32.xlu1 %v1795_v4, %s2678_s26 }
 0x8c5   : > { %1929 = vrot.lane.b32.xlu0 %v1797_v18, %s2678_s26 }
 0x8c7   : > { %1803 = vrot.lane.b32.xlu1 %v1796_v11, %s2675_s24 }
 0x8c9   : > { %1805 = vrot.lane.b32.xlu0 %v1798_v19, %s2675_s24  ;;  %s2682_s24 = smov [#allocation5]  }
 0x8ca   : > { %s2574_s22 = sshll.u32 %s2682_s24, 4  ;;  %s2575_s22 = int_to_ptr.vmem [resolvable:$false] %s2574_s22 }
 0x8cb   : > { %1823 = vrot.lane.b32.xlu1 %v1796_v11, %s3499_s18  ;;  %s2576_s0 = scalar_lea.vmem %s2575_s22, 256 }
 0x8cd   : > { %1825 = vrot.lane.b32.xlu0 %v1798_v19, %s3499_s18  ;;  %s2141_s18 = sshll.u32 %s3061_s21, 4  ;;  %s2142_s18 = int_to_ptr.vmem [resolvable:$true] %s2141_s18 }
 0x8ce   : > { %p2577_p0 = scmp.lt.s32.totalorder %s2142_s18, %s2575_s22 }
 0x8cf   : > { %1843 = vrot.lane.b32.xlu1 %v1796_v11, %s3500_s23 }
 0x8d1   : > { %1845 = vrot.lane.b32.xlu0 %v1798_v19, %s3500_s23  ;;  %s2122_s23 = scalar_lea.sflag [#allocation6], %s3050_s17 }
 0x8d3   : > { %1863 = vrot.lane.b32.xlu1 %v1796_v11, %s3501_s29 }
 0x8d5   : > { %1865 = vrot.lane.b32.xlu0 %v1798_v19, %s3501_s29  ;;  %s2570_s29 = scalar_lea.vmem %s2142_s18, 128 }
 0x8d6   : > { %p2571_p11 = scmp.ne.s32.totalorder %s2142_s18, %s2570_s29  ;;  %p2578_p1 = scmp.lt.s32.totalorder %s2576_s0, %s2570_s29 }
 0x8d7   : > { %1947 = vrot.lane.b32.xlu1 %v1795_v4, %s2680_s16 }
 0x8d8   : > { %p2572_p12 = pnand %p2571_p11, %p2795_p5  ;;  %p2579_p2 = por %p2578_p1, %p2577_p0 }
 0x8d9   : > { %1949 = vrot.lane.b32.xlu0 %v1797_v18, %s2680_s16 }
 0x8da   : > { %p2573_p13 = pneg %p2572_p12 }
 0x8db   : > { %1891 = vrot.lane.b32.xlu1 %v1796_v11, %s2677_s25 }
 0x8dc   : > { %p2580_p3 = pnand %p2579_p2, %p2573_p13 }
 0x8dd   : > { %1893 = vrot.lane.b32.xlu0 %v1798_v19, %s2677_s25  ;;  %s2300_s25 = sshll.u32 %s2778_s11, 7 }
 0x8df   : > { %1911 = vrot.lane.b32.xlu1 %v1796_v11, %s2679_s14 }
 0x8e1   : > { %1913 = vrot.lane.b32.xlu0 %v1798_v19, %s2679_s14 }
 0x8e3   : > { %1931 = vrot.lane.b32.xlu1 %v1796_v11, %s2678_s26 }
 0x8e5   : > { %1933 = vrot.lane.b32.xlu0 %v1798_v19, %s2678_s26 }
 0x8e7   : > { %1951 = vrot.lane.b32.xlu1 %v1796_v11, %s2680_s16 }
 0x8e9   : > { %1953 = vrot.lane.b32.xlu0 %v1798_v19, %s2680_s16  ;;  %s3399_s16 = scalar_lea.hbm %s3484_s12, %s2300_s25 }
 0x8eb   : > { %2023 = vperm.xlu1 %2520, %v490_v35  }
 0x91d   : > { %v1800_v36 = vpop.permute.xlu1 %1799 }
 0x91f   : > { %v1802_v37 = vpop.permute.xlu0 %1801 }
 0x921   : > { %v1820_v39 = vpop.permute.xlu1 %1819 }
 0x923   : > { %v1822_v40 = vpop.permute.xlu0 %1821 }
 0x925   : > { %v1840_v53 = vpop.permute.xlu1 %1839 }
 0x927   : > { %v1842_v41 = vpop.permute.xlu0 %1841 }
 0x929   : > { %v1860_v8 = vpop.permute.xlu1 %1859 }
 0x92b   : > { %v1862_v42 = vpop.permute.xlu0 %1861 }
 0x92d   : > { %v3267_v45 = vpop.permute.xlu1 %1887 }
 0x92f   : > { %v3269_v47 = vpop.permute.xlu0 %1889 }
 0x931   : > { %v3271_v15 = vpop.permute.xlu1 %1907 }
 0x933   : > { %v3273_v48 = vpop.permute.xlu0 %1909 }
 0x935   : > { %v3275_v13 = vpop.permute.xlu1 %1927 }
 0x937   : > { %v3277_v51 = vpop.permute.xlu0 %1929 }
 0x939   : > { %v1804_v1 = vpop.permute.xlu1 %1803 }
 0x93a   : > { %v1807_v54 = vsel %vm1526_vm7, %v1800_v36, %v1804_v1  ;;  %v1809_v55 = vsel %vm1526_vm7, %v1804_v1, %v1800_v36 }
 0x93b   : > { %v1806_v57 = vpop.permute.xlu0 %1805  ;;  %v1811_v61 = vmul.f32 %v1809_v55, %v3120_v31  ;;  %v1812_v62 = vmul.f32 %v1807_v54, %v3124_v32 }
 0x93c   : > { %v1808_v60 = vsel %vm1526_vm7, %v1802_v37, %v1806_v57  ;;  %v1810_v46 = vsel %vm1526_vm7, %v1806_v57, %v1802_v37 }
 0x93d   : > { %v1813_v63 = vmul.f32 %v1810_v46, %v3120_v31  ;;  %v1814_v0 = vmul.f32 %v1808_v60, %v3124_v32  ;;  %v1824_v4 = vpop.permute.xlu1 %1823 }
 0x93e   : > { %v1827_v5 = vsel %vm1545_vm5, %v1820_v39, %v1824_v4  ;;  %v1829_v6 = vsel %vm1545_vm5, %v1824_v4, %v1820_v39 }
 0x93f   : > { %v2003_v11 = vpack.c.bf16 %v1813_v63, %v1811_v61  ;;  %v1826_v16 = vpop.permute.xlu0 %1825  ;;  %v2004_v18 = vpack.c.bf16 %v1814_v0, %v1812_v62  ;;  %v1831_v31 = vmul.f32 %v1829_v6, %v3089_v9  ;;  %v1832_v32 = vmul.f32 %v1827_v5, %v3092_v10 }
 0x940   : > { %v1828_v19 = vsel %vm1545_vm5, %v1822_v40, %v1826_v16  ;;  %v1830_v43 = vsel %vm1545_vm5, %v1826_v16, %v1822_v40 }
 0x941   : > { %v1833_v59 = vmul.f32 %v1830_v43, %v3089_v9  ;;  %v1834_v28 = vmul.f32 %v1828_v19, %v3092_v10  ;;  %2057 = vmatprep.subr.bf16.mxu1 %v2004_v18  ;;  %v1844_v3 = vpop.permute.xlu1 %1843 }
 0x942   : > { %v1847_v34 = vsel %vm1570_vm8, %v1840_v53, %v1844_v3  ;;  %v1849_v35 = vsel %vm1570_vm8, %v1844_v3, %v1840_v53  ;;  %2058 = vmatpush1.bf16.msra.mxu1 %v2003_v11 }
 0x943   : > { %v2005_v36 = vpack.c.bf16 %v1833_v59, %v1831_v31  ;;  %v1846_v37 = vpop.permute.xlu0 %1845  ;;  %v2006_v39 = vpack.c.bf16 %v1834_v28, %v1832_v32  ;;  %v1851_v10 = vmul.f32 %v1849_v35, %v3132_v38  ;;  %v1852_v1 = vmul.f32 %v1847_v34, %v3137_v7 }
 0x944   : > { %v1848_v40 = vsel %vm1570_vm8, %v1842_v41, %v1846_v37  ;;  %v1850_v9 = vsel %vm1570_vm8, %v1846_v37, %v1842_v41 }
 0x945   : > { %v1853_v54 = vmul.f32 %v1850_v9, %v3132_v38  ;;  %v1854_v55 = vmul.f32 %v1848_v40, %v3137_v7  ;;  %2059 = vmatprep.subr.bf16.mxu1 %v2006_v39  ;;  %v1864_v53 = vpop.permute.xlu1 %1863 }
 0x946   : > { %v1867_v57 = vsel %vm1589_vm6, %v1860_v8, %v1864_v53  ;;  %v1869_v60 = vsel %vm1589_vm6, %v1864_v53, %v1860_v8  ;;  %2060 = vmatpush1.bf16.msra.mxu1 %v2005_v36 }
 0x947   : > { %v2007_v46 = vpack.c.bf16 %v1853_v54, %v1851_v10  ;;  %v1866_v61 = vpop.permute.xlu0 %1865  ;;  %v2008_v41 = vpack.c.bf16 %v1854_v55, %v1852_v1  ;;  %v1871_v7 = vmul.f32 %v1869_v60, %v3100_v17  ;;  %v1872_v63 = vmul.f32 %v1867_v57, %v3105_v21 }
 0x948   : > { %v1868_v62 = vsel %vm1589_vm6, %v1862_v42, %v1866_v61  ;;  %v1870_v38 = vsel %vm1589_vm6, %v1866_v61, %v1862_v42 }
 0x949   : > { %v1873_v0 = vmul.f32 %v1870_v38, %v3100_v17  ;;  %v1874_v4 = vmul.f32 %v1868_v62, %v3105_v21  ;;  %2061 = vmatprep.subr.bf16.mxu1 %v2008_v41  ;;  %v1948_v8 = vpop.permute.xlu1 %1947 }
 0x94a   : > { %2062 = vmatpush1.bf16.msra.mxu1 %v2007_v46 }
 0x94b   : > { %v2009_v5 = vpack.c.bf16 %v1873_v0, %v1871_v7  ;;  %v1950_v6 = vpop.permute.xlu0 %1949  ;;  %v2010_v11 = vpack.c.bf16 %v1874_v4, %v1872_v63 }
 0x94d   : > { %2063 = vmatprep.subr.bf16.mxu1 %v2010_v11  ;;  %v1892_v16 = vpop.permute.xlu1 %1891 }
 0x94e   : > { %v1895_v42 = vsel %vm1626_vm9, %v3267_v45, %v1892_v16  ;;  %v1897_v18 = vsel %vm1626_vm9, %v1892_v16, %v3267_v45  ;;  %2064 = vmatpush1.bf16.msra.mxu1 %v2009_v5 }
 0x94f   : > { %v1894_v17 = vpop.permute.xlu0 %1893  ;;  %2065 = vmatprep.subr.bf16.mxu1 %v2012_v27  ;;  %v1899_v43 = vmul.f32 %v1895_v42, %v3149_v49  ;;  %v1900_v31 = vmul.f32 %v1897_v18, %v3152_v50 }
 0x950   : > { %v1896_v21 = vsel %vm1626_vm9, %v3269_v47, %v1894_v17  ;;  %v1898_v19 = vsel %vm1626_vm9, %v1894_v17, %v3269_v47 }
 0x951   : > { %v1901_v45 = vmul.f32 %v1896_v21, %v3149_v49  ;;  %v1902_v32 = vmul.f32 %v1898_v19, %v3152_v50  ;;  %v1912_v59 = vpop.permute.xlu1 %1911 }
 0x952   : > { %v1915_v24 = vsel %vm1651_vm11, %v3271_v15, %v1912_v59  ;;  %v1917_v25 = vsel %vm1651_vm11, %v1912_v59, %v3271_v15  ;;  %2066 = vmatpush1.bf16.msra.mxu1 %v2011_v26 }
 0x953   : > { %v2013_v27 = vpack.c.bf16 %v1901_v45, %v1899_v43  ;;  %v1914_v47 = vpop.permute.xlu0 %1913  ;;  %v2014_v28 = vpack.c.bf16 %v1902_v32, %v1900_v31  ;;  %v1919_v3 = vmul.f32 %v1915_v24, %v3176_v12  ;;  %v1920_v34 = vmul.f32 %v1917_v25, %v3179_v14 }
 0x954   : > { %v1916_v49 = vsel %vm1651_vm11, %v3273_v48, %v1914_v47  ;;  %v1918_v50 = vsel %vm1651_vm11, %v1914_v47, %v3273_v48 }
 0x955   : > { %v1921_v15 = vmul.f32 %v1916_v49, %v3176_v12  ;;  %v1922_v20 = vmul.f32 %v1918_v50, %v3179_v14  ;;  %v1932_v23 = vpop.permute.xlu1 %1931  ;;  %2067 = vmatprep.subr.bf16.mxu1 %v2014_v28 }
 0x956   : > { %v1935_v26 = vsel %vm1670_vm10, %v3275_v13, %v1932_v23  ;;  %v1937_v35 = vsel %vm1670_vm10, %v1932_v23, %v3275_v13  ;;  %2068 = vmatpush1.bf16.msra.mxu1 %v2013_v27 }
 0x957   : > { %v2015_v48 = vpack.c.bf16 %v1921_v15, %v1919_v3  ;;  %v1934_v36 = vpop.permute.xlu0 %1933  ;;  %v2016_v37 = vpack.c.bf16 %v1922_v20, %v1920_v34  ;;  %v1939_v39 = vmul.f32 %v1935_v26, %v3160_v56  ;;  %v1940_v40 = vmul.f32 %v1937_v35, %v3165_v44 }
 0x958   : > { %v1936_v12 = vsel %vm1670_vm10, %v3277_v51, %v1934_v36  ;;  %v1938_v14 = vsel %vm1670_vm10, %v1934_v36, %v3277_v51 }
 0x959   : > { %v1941_v9 = vmul.f32 %v1936_v12, %v3160_v56  ;;  %v1942_v13 = vmul.f32 %v1938_v14, %v3165_v44  ;;  %v1952_v10 = vpop.permute.xlu1 %1951  ;;  %2069 = vmatprep.subr.bf16.mxu1 %v2016_v37 }
 0x95a   : > { %v1955_v1 = vsel %vm1695_vm12, %v1948_v8, %v1952_v10  ;;  %v1957_v54 = vsel %vm1695_vm12, %v1952_v10, %v1948_v8  ;;  %2070 = vmatpush1.bf16.msra.mxu1 %v2015_v48 }
 0x95b   : > { %v2017_v55 = vpack.c.bf16 %v1941_v9, %v1939_v39  ;;  %v1954_v53 = vpop.permute.xlu0 %1953  ;;  %v2018_v51 = vpack.c.bf16 %v1942_v13, %v1940_v40  ;;  %v1959_v44 = vmul.f32 %v3191_v30, %v1955_v1  ;;  %v1960_v60 = vmul.f32 %v3196_v33, %v1957_v54 }
 0x95c   : > { %v1956_v57 = vsel %vm1695_vm12, %v1950_v6, %v1954_v53  ;;  %v1958_v56 = vsel %vm1695_vm12, %v1954_v53, %v1950_v6 }
 0x95d   : > { %v1961_v46 = vmul.f32 %v3191_v30, %v1956_v57  ;;  %v1962_v61 = vmul.f32 %v3196_v33, %v1958_v56  ;;  %2071 = vmatprep.subr.bf16.mxu1 %v2018_v51 }
 0x95e   : > { %2072 = vmatpush1.bf16.msra.mxu1 %v2017_v55 }
 0x95f   : > { %v2019_v41 = vpack.c.bf16 %v1961_v46, %v1959_v44  ;;  %v2020_v62 = vpack.c.bf16 %v1962_v61, %v1960_v60 }
 0x961   : > { %2073 = vmatprep.subr.bf16.mxu1 %v2020_v62 }
 0x962   : > { %2074 = vmatpush1.bf16.msra.mxu1 %v2019_v41 }
 0x965   : > { %2090 = vmatmul.mubr.bf16.vlgmr.msra.gmra.mrb[28].mxu1 %v2045_v2 }
 0x966   : > { %2583 = shalt.err (!%p2580_p3)
}
 0x967   : > { %s2584_s21 = scalar_lea.hbm %s3399_s16, 128  ;;  %s2588_s14 = scalar_lea.hbm %s3484_s12, 256 }
 0x968   : > { %p2585_p4 = scmp.ne.s32.totalorder %s3399_s16, %s2584_s21  ;;  %p2589_p9 = scmp.lt.u32.totalorder %s3399_s16, %s3484_s12 }
 0x969   : > { %p2590_p10 = scmp.lt.u32.totalorder %s2588_s14, %s2584_s21  ;;  %p2592_p12 = scmp.lt.u32.totalorder %s2584_s21, %s3399_s16 }
 0x96a   : > { %p2586_p7 = pnand %p2585_p4, %p2795_p5 }
 0x96b   : > { %p2591_p11 = por %p2590_p10, %p2589_p9 }
 0x96c   : > { %p2587_p8 = pneg %p2586_p7 }
 0x96d   : > { %p2593_p13 = por %p2592_p12, %p2591_p11 }
 0x96f   : > { %p2594_p0 = pnand %p2593_p13, %p2587_p8 }
 0x971   : > { %2597 = shalt.err (!%p2594_p0)
}
 0x972   : > { %2459 = dma.vmem_to_hbm [thread:$0]  (%p2795_p5), %s2142_s18, 128, %s3399_s16, %s2122_s23   ;;  %v2024_v30 = vpop.permute.xlu1 %2023  ;;  %vm2118_vm15 = vcmp.lt.s32.totalorder %v1524_v52, 256 }
 0x973   : > { %v2029_v33 = vrot.slane %v2024_v30, %v3108_v22  ;;  %s2251_s0 = sshll.u32 %s3050_s17, 1  ;;  %s2301_s29 = sshll.u32 %s2778_s11, 5 }
 0x974   : > { %s446_s21 = scalar_lea.vmem [#allocation7], %s2251_s0  ;;  %s3429_s23 = scalar_lea.hbm %s3485_s13, %s2301_s29 }
 0x975   : > { %s2155_s25 = sshll.u32 %s446_s21, 4  ;;  %s2127_s11 = scalar_lea.sflag [#allocation8], %s3050_s17  ;;  %s3431_s25 = int_to_ptr.vmem [resolvable:$true] %s2155_s25 }
 0x976   : > { %s2598_s26 = scalar_lea.vmem %s3431_s25, 32  ;;  %s2683_s14 = smov [#allocation7]  }
 0x977   : > { %p2599_p1 = scmp.ne.s32.totalorder %s3431_s25, %s2598_s26  ;;  %s2602_s24 = sshll.u32 %s2683_s14, 4  ;;  %s2603_s24 = int_to_ptr.vmem [resolvable:$false] %s2602_s24 }
 0x978   : > { %s2604_s22 = scalar_lea.vmem %s2603_s24, 64  ;;  %p2605_p4 = scmp.lt.s32.totalorder %s3431_s25, %s2603_s24 }
 0x979   : > { %p2600_p2 = pnand %p2599_p1, %p2795_p5  ;;  %p2606_p7 = scmp.lt.s32.totalorder %s2604_s22, %s2598_s26 }
 0x97b   : > { %p2601_p3 = pneg %p2600_p2  ;;  %p2607_p8 = por %p2606_p7, %p2605_p4 }
 0x97d   : > { %p2608_p9 = pnand %p2607_p8, %p2601_p3 }
 0xa38   : > { %v2091_v29 = vpop.f32.mrb[28].mxu1 }
 0xa39   : > { %v2092_v38 = vadd.f32 %v2091_v29, %v2029_v33  ;;  %v2093_v7 = vpop.f32.mrb[29].mxu1 }
 0xa3a   : > { %v2094_v63 = vadd.f32 %v2093_v7, %v2029_v33  ;;  %v2095_v0 = vpop.f32.mrb[30].mxu1 }
 0xa3b   : > { %v2096_v4 = vpop.f32.mrb[31].mxu1 }
 0xa3c   : > { %v2100_v8 = vcombine.low %v2092_v38, %v2094_v63 }
 0xa3e   : > { %v2107_v5 = vrot.slane %v2100_v8, %v3259_v58 }
 0xa40   : > { %v2114_v6 = vrot.slane %v2107_v5, %v3259_v58 }
 0xa42   : > { %2120 = vst.msk [vmem:[%s446_s21] sm:$0x3] %vm2118_vm15, %v2114_v6 }
 0xa43   : > { %2611 = shalt.err (!%p2608_p9)
}
 0xa44   : > { %s2612_s17 = scalar_lea.hbm %s3429_s23, 32  ;;  %s2616_s21 = scalar_lea.hbm %s3485_s13, 64 }
 0xa45   : > { %p2613_p10 = scmp.ne.s32.totalorder %s3429_s23, %s2612_s17  ;;  %p2617_p13 = scmp.lt.u32.totalorder %s3429_s23, %s3485_s13 }
 0xa46   : > { %p2618_p0 = scmp.lt.u32.totalorder %s2616_s21, %s2612_s17  ;;  %p2620_p2 = scmp.lt.u32.totalorder %s2612_s17, %s3429_s23 }
 0xa47   : > { %p2614_p11 = pnand %p2613_p10, %p2795_p5 }
 0xa48   : > { %p2619_p1 = por %p2618_p0, %p2617_p13 }
 0xa49   : > { %p2615_p12 = pneg %p2614_p11 }
 0xa4a   : > { %p2621_p3 = por %p2620_p2, %p2619_p1 }
 0xa4c   : > { %p2622_p4 = pnand %p2621_p3, %p2615_p12 }
 0xa4e   : > { %2625 = shalt.err (!%p2622_p4)
}
 0xa4f   : > { %2460 = dma.vmem_to_hbm [thread:$0]  (%p2795_p5), %s3431_s25, 32, %s3429_s23, %s2127_s11  }
 0xa50 PF: > { %p2470_p7 = scmp.ge.s32.totalorder %s2664_s30, 2  ;;  %s2167_s26 = sand.u32 1, %s2652_s27  }
 0xa51   : > { %s2168_s14 = scalar_lea.sflag [#allocation6], %s2167_s26 }
 0xa52   : > { %p2464_p8 = pnand %p2470_p7, %p2799_p6 }
 0xa54   : > { %2643 = dma.done.wait (!%p2464_p8), %s2168_s14, 128  }
 0xa55   : > { %2645 = vsyncadd (!%p2464_p8), %s2168_s14, 4294967168  ;;  %s2177_s24 = scalar_lea.sflag [#allocation8], %s2167_s26 }
 0xa56   : > { %2647 = dma.done.wait (!%p2464_p8), %s2177_s24, 32  }
 0xa57   : > { %2649 = vsyncadd (!%p2464_p8), %s2177_s24, 4294967264  ;;  %s3502_s19 = sld [smem:[#allocation11_spill]]  ;;  %s3503_s29 = sld [smem:[#allocation12_spill]] }
 0xa58   : > { %p29_p5 = scmp.ge.s32.totalorder %s2782_s15, 4   ;;  %s3504_s27 = smov %s2656_s28 }
 0xa59   : > { %s3506_s30 = smov %s2782_s15 }
 0xa5a   :  { %31 = sbr.rel (!%p29_p5) target bundleno = 8 (0x8), region = 120 }
 0xa5d   : > { %s3505_s28 = smov %s3502_s19 }
 0xa61   :  { %2182 = vsyncpa [#allocation6], 1 }
 0xa62   :  { %2184 = vsyncpa [#allocation6 + $0x1], 1 }
 0xa63   :  { %2185 = vsyncpa [#allocation8], 1 }
 0xa64   :  { %2187 = vsyncpa [#allocation8 + $0x1], 1 }

</bundles_post_ra>
